<compile_context>
chip_gen: v7x
topology: tpu7x:2x2x1
jax: 0.10.0
libtpu: 0.0.40
codegen_flags: <defaults>
</compile_context>

<pallas_src>
import functools

import jax
import jax.numpy as jnp
from jax.experimental import pallas as pl
from jax.experimental.pallas import tpu as pltpu


def _attention_kernel(x_ref, wqkv_ref, wp_ref, bp_ref, o_ref, y_ref,
                      *, tb, n, c, num_heads, head_dim, mxu_dtype):
    """One grid step == TB batch elements.

    x_ref    : (TB, N, C)  input tile
    wqkv_ref : (C, 3C)     fused [Q | K | V] weight, (in, out) layout,
                           attention scale pre-folded into the Q columns
    wp_ref   : (C, C)      output projection weight, (in, out) layout
    bp_ref   : (1, C)      output projection bias
    o_ref    : (TB, N, C)  output tile
    y_ref    : (TB*N, C)   f32 VMEM accumulator (lane-dense)
    """
    # Flatten the batch tile into the row (sublane) dim; lane dim C unchanged.
    x2d = x_ref[...].reshape(tb * n, c)

    # Fused QKV projection: one MXU pass with M = TB*N, Nout = 3C.
    # (qkv_bias=False in the reference module; scale already folded into Wq.)
    qkv = jnp.dot(x2d, wqkv_ref[...], preferred_element_type=jnp.float32)

    # Per-head attention, batched over TB inside each dot_general.  The output
    # projection is accumulated head-by-head into the lane-dense slab, so no
    # head_dim-wide (masked) stores ever happen.
    for h in range(num_heads):
        lo = h * head_dim
        qh = qkv[:, lo:lo + head_dim].reshape(tb, n, head_dim)
        kh = qkv[:, c + lo:c + lo + head_dim].reshape(tb, n, head_dim)
        vh = qkv[:, 2 * c + lo:2 * c + lo + head_dim].reshape(tb, n, head_dim)

        # scores = (q * scale) @ k^T, batched over TB (scale folded in Wq).
        s = jnp.einsum('bqd,bkd->bqk',
                       qh.astype(mxu_dtype), kh.astype(mxu_dtype),
                       preferred_element_type=jnp.float32)        # (TB, N, N)

        # Numerically-stable softmax; normalization deferred until after the
        # PV matmul so the reciprocal multiply lands on (N, hd), not (N, N).
        s = s - jnp.max(s, axis=-1, keepdims=True)
        e = jnp.exp(s)
        inv = pl.reciprocal(jnp.sum(e, axis=-1, keepdims=True), approx=True)

        ctx = jnp.einsum('bqk,bkd->bqd',
                         e.astype(mxu_dtype), vh.astype(mxu_dtype),
                         preferred_element_type=jnp.float32)      # (TB, N, hd)
        ctx = (ctx * inv).reshape(tb * n, head_dim)

        # Fold the output projection into the head loop: (TB*N, hd) @ (hd, C)
        # accumulated into the full-C accumulator (lane-dense stores).  The wp
        # row slice is a sublane slice (aligned for head_dim multiples of 8).
        delta = jnp.dot(ctx.astype(mxu_dtype), wp_ref[lo:lo + head_dim, :],
                        preferred_element_type=jnp.float32)
        if h == 0:
            y_ref[...] = delta
        else:
            y_ref[...] += delta

    # Bias added once; attn_drop / proj_drop are identity in eval mode.
    y = y_ref[...] + bp_ref[...].astype(jnp.float32)
    o_ref[...] = y.reshape(tb, n, c).astype(o_ref.dtype)


def _pick_batch_tile(B, N, max_rows=1024):
    """Largest divisor of B with TB*N <= max_rows (amortizes the ~0.35us
    per-grid-step overhead on single-TC v5e/v6e).  If that would leave a
    single grid step but an even >= 2-step split still fills the MXU rows
    (>= 256), prefer the even split so dual-TC v7x gets both cores busy."""
    divs = [tb for tb in range(1, B + 1) if B % tb == 0 and tb * N <= max_rows]
    if not divs:
        return 1
    tb = max(divs)
    if B // tb < 2:
        even = [t for t in divs if (B // t) % 2 == 0 and t * N >= 256]
        if even:
            tb = max(even)
    return tb


def _vmem_bytes_estimate(TB, N, C, x_itemsize, w_itemsize):
    tile = TB * N * C
    est = 2 * 2 * tile * x_itemsize                     # in/out tiles, double-buffered
    est += 2 * (3 * C * C + C * C + C) * w_itemsize     # weights + bias, double-buffered
    est += TB * N * 3 * C * 4                           # qkv f32 intermediate
    est += TB * N * C * 4                               # f32 accumulator scratch
    est += 2 * TB * N * N * 4                           # one head's scores + exp
    return est


def attention_pallas(x, w_qkv, w_proj, b_proj, num_heads, batch_tile=None):
    """x: (B, N, C); w_qkv: (3C, C) torch-layout; w_proj: (C, C) torch-layout."""
    B, N, C = x.shape
    head_dim = C // num_heads
    scale = head_dim ** (-0.5)

    # Glue: torch Linear weight (out, in) -> (in, out).  Transposing the packed
    # qkv weight gives fused columns ordered [q | k | v] (heads contiguous).
    # Fold the attention scale into the Q columns (free, host-side).
    w_qkv_t = w_qkv.T                                        # (C, 3C)
    w_qkv_t = jnp.concatenate([w_qkv_t[:, :C] * scale, w_qkv_t[:, C:]], axis=1)
    w_proj_t = w_proj.T                                      # (C, C)
    bp = b_proj.reshape(1, C)                                # (1, C)

    TB = batch_tile if batch_tile is not None else _pick_batch_tile(B, N)
    assert B % TB == 0, "batch_tile must divide B"

    # bf16 inputs: run MXU operands in bf16 (f32 accumulation via
    # preferred_element_type); otherwise keep f32 operands.  Softmax stays f32.
    mxu_dtype = jnp.bfloat16 if x.dtype == jnp.bfloat16 else jnp.float32

    kernel = functools.partial(
        _attention_kernel,
        tb=TB, n=N, c=C, num_heads=num_heads, head_dim=head_dim,
        mxu_dtype=mxu_dtype)

    # Only raise the scoped-VMEM limit when the footprint actually needs it
    # (keeps headroom on 64 MiB v7x parts).
    est = _vmem_bytes_estimate(TB, N, C, x.dtype.itemsize, w_qkv_t.dtype.itemsize)
    vmem_limit_bytes = None
    if est > 30 * 1024 * 1024:
        vmem_limit_bytes = int(min(112 * 1024 * 1024, est * 1.5))

    return pl.pallas_call(
        kernel,
        out_shape=jax.ShapeDtypeStruct((B, N, C), x.dtype),
        grid_spec=pltpu.PrefetchScalarGridSpec(
            num_scalar_prefetch=0,
            grid=(B // TB,),
            in_specs=[
                pl.BlockSpec((TB, N, C), lambda b: (b, 0, 0)),      # x tile
                pl.BlockSpec((C, 3 * C), lambda b: (0, 0)),         # fused Wqkv
                pl.BlockSpec((C, C), lambda b: (0, 0)),             # Wproj
                pl.BlockSpec((1, C), lambda b: (0, 0)),             # bias
            ],
            out_specs=pl.BlockSpec((TB, N, C), lambda b: (b, 0, 0)),
            scratch_shapes=[pltpu.VMEM((TB * N, C), jnp.float32)],  # accumulator
        ),
        compiler_params=pltpu.CompilerParams(
            dimension_semantics=("parallel",),
            vmem_limit_bytes=vmem_limit_bytes),
    )(x, w_qkv_t, w_proj_t, bp)


def attention_reference(x, w_qkv, w_proj, b_proj, num_heads):
    """Pure-JAX mirror of the PyTorch forward for validation."""
    B, N, C = x.shape
    hd = C // num_heads
    scale = hd ** (-0.5)
    qkv = x @ w_qkv.T                                     # (B, N, 3C)
    qkv = qkv.reshape(B, N, 3, num_heads, hd).transpose(2, 0, 3, 1, 4)
    q, k, v = qkv[0], qkv[1], qkv[2]                      # (B, H, N, hd)
    attn = jnp.einsum('bhnd,bhmd->bhnm', q, k) * scale
    attn = jax.nn.softmax(attn, axis=-1)
    out = jnp.einsum('bhnm,bhmd->bhnd', attn, v)          # (B, H, N, hd)
    out = out.transpose(0, 2, 1, 3).reshape(B, N, C)
    return out @ w_proj.T + b_proj


if __name__ == "__main__":
    B, N, C = 2, 8, 32
    num_heads = 8

    key = jax.random.PRNGKey(0)
    kx, kqkv, kp, kb = jax.random.split(key, 4)

    x = jax.random.normal(kx, (B, N, C), dtype=jnp.float32)
    # Deterministic synthetic parameters (module __init__ shapes):
    #   qkv:  Linear(C, 3C, bias=False) -> weight (3C, C)
    #   proj: Linear(C, C)              -> weight (C, C), bias (C,)
    w_qkv = jax.random.normal(kqkv, (3 * C, C), dtype=jnp.float32) * 0.1
    w_proj = jax.random.normal(kp, (C, C), dtype=jnp.float32) * 0.1
    b_proj = jax.random.normal(kb, (C,), dtype=jnp.float32) * 0.1

    out = attention_pallas(x, w_qkv, w_proj, b_proj, num_heads)
    jax.block_until_ready(out)

    ref = attention_reference(x, w_qkv, w_proj, b_proj, num_heads)
    assert out.shape == (B, N, C)
    # approx=True reciprocal (EUP vrcp) -> slightly relaxed tolerance.
    assert jnp.allclose(out, ref, atol=2e-3, rtol=2e-3), "mismatch vs reference"

    print("KERNEL_OK")
</pallas_src>

<mosaic_0001>
module attributes {stable_mosaic.version = 11 : i64} {
  func.func @_attention_kernel(%arg0: i32, %arg1: memref<2x8x32xf32, #tpu.memory_space<vmem>>, %arg2: memref<32x96xf32, #tpu.memory_space<vmem>>, %arg3: memref<32x32xf32, #tpu.memory_space<vmem>>, %arg4: memref<1x32xf32, #tpu.memory_space<vmem>>, %arg5: memref<2x8x32xf32, #tpu.memory_space<vmem>>, %arg6: memref<16x32xf32, #tpu.memory_space<vmem>>) attributes {dimension_semantics = [#tpu.dimension_semantics<parallel>], iteration_bounds = array<i64: 1>, scalar_prefetch = 0 : i64, scratch_operands = 1 : i64, tpu.core_type = #tpu.core_type<tc>, window_params = [{transform_indices = @transform_0, window_bounds = array<i64: 2, 8, 32>}, {pipeline_mode = #tpu.pipeline_mode<synchronous>, transform_indices = @transform_1, window_bounds = array<i64: 32, 96>}, {pipeline_mode = #tpu.pipeline_mode<synchronous>, transform_indices = @transform_2, window_bounds = array<i64: 32, 32>}, {pipeline_mode = #tpu.pipeline_mode<synchronous>, transform_indices = @transform_3, window_bounds = array<i64: 1, 32>}, {transform_indices = @transform_4, window_bounds = array<i64: 2, 8, 32>}]} {
    %c0 = arith.constant 0 : index
    %c0_0 = arith.constant 0 : index
    %c0_1 = arith.constant 0 : index
    %0 = vector.load %arg1[%c0, %c0_0, %c0_1] : memref<2x8x32xf32, #tpu.memory_space<vmem>>, vector<2x8x32xf32>
    %1 = vector.shape_cast %0 : vector<2x8x32xf32> to vector<16x32xf32>
    %c0_2 = arith.constant 0 : index
    %c0_3 = arith.constant 0 : index
    %2 = vector.load %arg2[%c0_2, %c0_3] : memref<32x96xf32, #tpu.memory_space<vmem>>, vector<32x96xf32>
    %cst = arith.constant dense<0.000000e+00> : vector<16x96xf32>
    %3 = tpu.matmul %1, %2, %cst {dimension_numbers = #tpu.dot_dimension_numbers<[1], [0], [0], [1], [0, 0, 1, 1], [], []>} : vector<16x32xf32>, vector<32x96xf32>, vector<16x96xf32> -> vector<16x96xf32>
    %4 = vector.extract_strided_slice %3 {offsets = [0, 0], sizes = [16, 4], strides = [1, 1]} : vector<16x96xf32> to vector<16x4xf32>
    %5 = vector.shape_cast %4 : vector<16x4xf32> to vector<2x8x4xf32>
    %6 = vector.extract_strided_slice %3 {offsets = [0, 32], sizes = [16, 4], strides = [1, 1]} : vector<16x96xf32> to vector<16x4xf32>
    %7 = vector.shape_cast %6 : vector<16x4xf32> to vector<2x8x4xf32>
    %8 = vector.extract_strided_slice %3 {offsets = [0, 64], sizes = [16, 4], strides = [1, 1]} : vector<16x96xf32> to vector<16x4xf32>
    %9 = vector.shape_cast %8 : vector<16x4xf32> to vector<2x8x4xf32>
    "tpu.trace_start"() <{level = 10 : i32, message = "bqd,bkd->bqk"}> : () -> ()
    %cst_4 = arith.constant dense<0.000000e+00> : vector<2x8x8xf32>
    %10 = tpu.matmul %5, %7, %cst_4 {dimension_numbers = #tpu.dot_dimension_numbers<[2], [2], [1], [1], [0, 0, 0, 1, 1, 1], [0], [0]>} : vector<2x8x4xf32>, vector<2x8x4xf32>, vector<2x8x8xf32> -> vector<2x8x8xf32>
    "tpu.trace_stop"() : () -> ()
    %cst_5 = arith.constant dense<0xFF800000> : vector<2x8xf32>
    %11 = vector.multi_reduction <maximumf>, %10, %cst_5 [2] : vector<2x8x8xf32> to vector<2x8xf32>
    %12 = vector.shape_cast %11 : vector<2x8xf32> to vector<2x8x1xf32>
    %13 = vector.broadcast %12 : vector<2x8x1xf32> to vector<2x8x8xf32>
    %14 = arith.subf %10, %13 : vector<2x8x8xf32>
    %15 = math.exp %14 : vector<2x8x8xf32>
    %cst_6 = arith.constant dense<0.000000e+00> : vector<2x8xf32>
    %16 = vector.multi_reduction <add>, %15, %cst_6 [2] : vector<2x8x8xf32> to vector<2x8xf32>
    %17 = vector.shape_cast %16 : vector<2x8xf32> to vector<2x8x1xf32>
    %18 = tpu.reciprocal %17 {approx = true} : vector<2x8x1xf32> -> vector<2x8x1xf32>
    "tpu.trace_start"() <{level = 10 : i32, message = "bqk,bkd->bqd"}> : () -> ()
    %cst_7 = arith.constant dense<0.000000e+00> : vector<2x8x4xf32>
    %19 = tpu.matmul %15, %9, %cst_7 {dimension_numbers = #tpu.dot_dimension_numbers<[2], [1], [1], [2], [0, 0, 0, 1, 1, 2], [0], [0]>} : vector<2x8x8xf32>, vector<2x8x4xf32>, vector<2x8x4xf32> -> vector<2x8x4xf32>
    "tpu.trace_stop"() : () -> ()
    %20 = vector.broadcast %18 : vector<2x8x1xf32> to vector<2x8x4xf32>
    %21 = arith.mulf %19, %20 : vector<2x8x4xf32>
    %22 = vector.shape_cast %21 : vector<2x8x4xf32> to vector<16x4xf32>
    %c0_8 = arith.constant 0 : index
    %c0_9 = arith.constant 0 : index
    %23 = vector.load %arg3[%c0_8, %c0_9] : memref<32x32xf32, #tpu.memory_space<vmem>>, vector<4x32xf32>
    %cst_10 = arith.constant dense<0.000000e+00> : vector<16x32xf32>
    %24 = tpu.matmul %22, %23, %cst_10 {dimension_numbers = #tpu.dot_dimension_numbers<[1], [0], [0], [1], [0, 0, 1, 1], [], []>} : vector<16x4xf32>, vector<4x32xf32>, vector<16x32xf32> -> vector<16x32xf32>
    %c0_11 = arith.constant 0 : index
    %c0_12 = arith.constant 0 : index
    %25 = vector.load %arg6[%c0_11, %c0_12] : memref<16x32xf32, #tpu.memory_space<vmem>>, vector<16x32xf32>
    tpu.vector_store %arg6[%c0_11, %c0_12], %24 {strides = array<i32>} : memref<16x32xf32, #tpu.memory_space<vmem>>, vector<16x32xf32>,
    %26 = vector.extract_strided_slice %3 {offsets = [0, 4], sizes = [16, 4], strides = [1, 1]} : vector<16x96xf32> to vector<16x4xf32>
    %27 = vector.shape_cast %26 : vector<16x4xf32> to vector<2x8x4xf32>
    %28 = vector.extract_strided_slice %3 {offsets = [0, 36], sizes = [16, 4], strides = [1, 1]} : vector<16x96xf32> to vector<16x4xf32>
    %29 = vector.shape_cast %28 : vector<16x4xf32> to vector<2x8x4xf32>
    %30 = vector.extract_strided_slice %3 {offsets = [0, 68], sizes = [16, 4], strides = [1, 1]} : vector<16x96xf32> to vector<16x4xf32>
    %31 = vector.shape_cast %30 : vector<16x4xf32> to vector<2x8x4xf32>
    "tpu.trace_start"() <{level = 10 : i32, message = "bqd,bkd->bqk"}> : () -> ()
    %cst_13 = arith.constant dense<0.000000e+00> : vector<2x8x8xf32>
    %32 = tpu.matmul %27, %29, %cst_13 {dimension_numbers = #tpu.dot_dimension_numbers<[2], [2], [1], [1], [0, 0, 0, 1, 1, 1], [0], [0]>} : vector<2x8x4xf32>, vector<2x8x4xf32>, vector<2x8x8xf32> -> vector<2x8x8xf32>
    "tpu.trace_stop"() : () -> ()
    %cst_14 = arith.constant dense<0xFF800000> : vector<2x8xf32>
    %33 = vector.multi_reduction <maximumf>, %32, %cst_14 [2] : vector<2x8x8xf32> to vector<2x8xf32>
    %34 = vector.shape_cast %33 : vector<2x8xf32> to vector<2x8x1xf32>
    %35 = vector.broadcast %34 : vector<2x8x1xf32> to vector<2x8x8xf32>
    %36 = arith.subf %32, %35 : vector<2x8x8xf32>
    %37 = math.exp %36 : vector<2x8x8xf32>
    %cst_15 = arith.constant dense<0.000000e+00> : vector<2x8xf32>
    %38 = vector.multi_reduction <add>, %37, %cst_15 [2] : vector<2x8x8xf32> to vector<2x8xf32>
    %39 = vector.shape_cast %38 : vector<2x8xf32> to vector<2x8x1xf32>
    %40 = tpu.reciprocal %39 {approx = true} : vector<2x8x1xf32> -> vector<2x8x1xf32>
    "tpu.trace_start"() <{level = 10 : i32, message = "bqk,bkd->bqd"}> : () -> ()
    %cst_16 = arith.constant dense<0.000000e+00> : vector<2x8x4xf32>
    %41 = tpu.matmul %37, %31, %cst_16 {dimension_numbers = #tpu.dot_dimension_numbers<[2], [1], [1], [2], [0, 0, 0, 1, 1, 2], [0], [0]>} : vector<2x8x8xf32>, vector<2x8x4xf32>, vector<2x8x4xf32> -> vector<2x8x4xf32>
    "tpu.trace_stop"() : () -> ()
    %42 = vector.broadcast %40 : vector<2x8x1xf32> to vector<2x8x4xf32>
    %43 = arith.mulf %41, %42 : vector<2x8x4xf32>
    %44 = vector.shape_cast %43 : vector<2x8x4xf32> to vector<16x4xf32>
    %c4 = arith.constant 4 : index
    %c0_17 = arith.constant 0 : index
    %45 = vector.load %arg3[%c4, %c0_17] : memref<32x32xf32, #tpu.memory_space<vmem>>, vector<4x32xf32>
    %cst_18 = arith.constant dense<0.000000e+00> : vector<16x32xf32>
    %46 = tpu.matmul %44, %45, %cst_18 {dimension_numbers = #tpu.dot_dimension_numbers<[1], [0], [0], [1], [0, 0, 1, 1], [], []>} : vector<16x4xf32>, vector<4x32xf32>, vector<16x32xf32> -> vector<16x32xf32>
    %c0_19 = arith.constant 0 : index
    %c0_20 = arith.constant 0 : index
    %47 = vector.load %arg6[%c0_19, %c0_20] : memref<16x32xf32, #tpu.memory_space<vmem>>, vector<16x32xf32>
    %48 = arith.addf %47, %46 : vector<16x32xf32>
    %c0_21 = arith.constant 0 : index
    %c0_22 = arith.constant 0 : index
    %49 = vector.load %arg6[%c0_21, %c0_22] : memref<16x32xf32, #tpu.memory_space<vmem>>, vector<16x32xf32>
    tpu.vector_store %arg6[%c0_21, %c0_22], %48 {strides = array<i32>} : memref<16x32xf32, #tpu.memory_space<vmem>>, vector<16x32xf32>,
    %50 = vector.extract_strided_slice %3 {offsets = [0, 8], sizes = [16, 4], strides = [1, 1]} : vector<16x96xf32> to vector<16x4xf32>
    %51 = vector.shape_cast %50 : vector<16x4xf32> to vector<2x8x4xf32>
    %52 = vector.extract_strided_slice %3 {offsets = [0, 40], sizes = [16, 4], strides = [1, 1]} : vector<16x96xf32> to vector<16x4xf32>
    %53 = vector.shape_cast %52 : vector<16x4xf32> to vector<2x8x4xf32>
    %54 = vector.extract_strided_slice %3 {offsets = [0, 72], sizes = [16, 4], strides = [1, 1]} : vector<16x96xf32> to vector<16x4xf32>
    %55 = vector.shape_cast %54 : vector<16x4xf32> to vector<2x8x4xf32>
    "tpu.trace_start"() <{level = 10 : i32, message = "bqd,bkd->bqk"}> : () -> ()
    %cst_23 = arith.constant dense<0.000000e+00> : vector<2x8x8xf32>
    %56 = tpu.matmul %51, %53, %cst_23 {dimension_numbers = #tpu.dot_dimension_numbers<[2], [2], [1], [1], [0, 0, 0, 1, 1, 1], [0], [0]>} : vector<2x8x4xf32>, vector<2x8x4xf32>, vector<2x8x8xf32> -> vector<2x8x8xf32>
    "tpu.trace_stop"() : () -> ()
    %cst_24 = arith.constant dense<0xFF800000> : vector<2x8xf32>
    %57 = vector.multi_reduction <maximumf>, %56, %cst_24 [2] : vector<2x8x8xf32> to vector<2x8xf32>
    %58 = vector.shape_cast %57 : vector<2x8xf32> to vector<2x8x1xf32>
    %59 = vector.broadcast %58 : vector<2x8x1xf32> to vector<2x8x8xf32>
    %60 = arith.subf %56, %59 : vector<2x8x8xf32>
    %61 = math.exp %60 : vector<2x8x8xf32>
    %cst_25 = arith.constant dense<0.000000e+00> : vector<2x8xf32>
    %62 = vector.multi_reduction <add>, %61, %cst_25 [2] : vector<2x8x8xf32> to vector<2x8xf32>
    %63 = vector.shape_cast %62 : vector<2x8xf32> to vector<2x8x1xf32>
    %64 = tpu.reciprocal %63 {approx = true} : vector<2x8x1xf32> -> vector<2x8x1xf32>
    "tpu.trace_start"() <{level = 10 : i32, message = "bqk,bkd->bqd"}> : () -> ()
    %cst_26 = arith.constant dense<0.000000e+00> : vector<2x8x4xf32>
    %65 = tpu.matmul %61, %55, %cst_26 {dimension_numbers = #tpu.dot_dimension_numbers<[2], [1], [1], [2], [0, 0, 0, 1, 1, 2], [0], [0]>} : vector<2x8x8xf32>, vector<2x8x4xf32>, vector<2x8x4xf32> -> vector<2x8x4xf32>
    "tpu.trace_stop"() : () -> ()
    %66 = vector.broadcast %64 : vector<2x8x1xf32> to vector<2x8x4xf32>
    %67 = arith.mulf %65, %66 : vector<2x8x4xf32>
    %68 = vector.shape_cast %67 : vector<2x8x4xf32> to vector<16x4xf32>
    %c8 = arith.constant 8 : index
    %c0_27 = arith.constant 0 : index
    %69 = vector.load %arg3[%c8, %c0_27] : memref<32x32xf32, #tpu.memory_space<vmem>>, vector<4x32xf32>
    %cst_28 = arith.constant dense<0.000000e+00> : vector<16x32xf32>
    %70 = tpu.matmul %68, %69, %cst_28 {dimension_numbers = #tpu.dot_dimension_numbers<[1], [0], [0], [1], [0, 0, 1, 1], [], []>} : vector<16x4xf32>, vector<4x32xf32>, vector<16x32xf32> -> vector<16x32xf32>
    %c0_29 = arith.constant 0 : index
    %c0_30 = arith.constant 0 : index
    %71 = vector.load %arg6[%c0_29, %c0_30] : memref<16x32xf32, #tpu.memory_space<vmem>>, vector<16x32xf32>
    %72 = arith.addf %71, %70 : vector<16x32xf32>
    %c0_31 = arith.constant 0 : index
    %c0_32 = arith.constant 0 : index
    %73 = vector.load %arg6[%c0_31, %c0_32] : memref<16x32xf32, #tpu.memory_space<vmem>>, vector<16x32xf32>
    tpu.vector_store %arg6[%c0_31, %c0_32], %72 {strides = array<i32>} : memref<16x32xf32, #tpu.memory_space<vmem>>, vector<16x32xf32>,
    %74 = vector.extract_strided_slice %3 {offsets = [0, 12], sizes = [16, 4], strides = [1, 1]} : vector<16x96xf32> to vector<16x4xf32>
    %75 = vector.shape_cast %74 : vector<16x4xf32> to vector<2x8x4xf32>
    %76 = vector.extract_strided_slice %3 {offsets = [0, 44], sizes = [16, 4], strides = [1, 1]} : vector<16x96xf32> to vector<16x4xf32>
    %77 = vector.shape_cast %76 : vector<16x4xf32> to vector<2x8x4xf32>
    %78 = vector.extract_strided_slice %3 {offsets = [0, 76], sizes = [16, 4], strides = [1, 1]} : vector<16x96xf32> to vector<16x4xf32>
    %79 = vector.shape_cast %78 : vector<16x4xf32> to vector<2x8x4xf32>
    "tpu.trace_start"() <{level = 10 : i32, message = "bqd,bkd->bqk"}> : () -> ()
    %cst_33 = arith.constant dense<0.000000e+00> : vector<2x8x8xf32>
    %80 = tpu.matmul %75, %77, %cst_33 {dimension_numbers = #tpu.dot_dimension_numbers<[2], [2], [1], [1], [0, 0, 0, 1, 1, 1], [0], [0]>} : vector<2x8x4xf32>, vector<2x8x4xf32>, vector<2x8x8xf32> -> vector<2x8x8xf32>
    "tpu.trace_stop"() : () -> ()
    %cst_34 = arith.constant dense<0xFF800000> : vector<2x8xf32>
    %81 = vector.multi_reduction <maximumf>, %80, %cst_34 [2] : vector<2x8x8xf32> to vector<2x8xf32>
    %82 = vector.shape_cast %81 : vector<2x8xf32> to vector<2x8x1xf32>
    %83 = vector.broadcast %82 : vector<2x8x1xf32> to vector<2x8x8xf32>
    %84 = arith.subf %80, %83 : vector<2x8x8xf32>
    %85 = math.exp %84 : vector<2x8x8xf32>
    %cst_35 = arith.constant dense<0.000000e+00> : vector<2x8xf32>
    %86 = vector.multi_reduction <add>, %85, %cst_35 [2] : vector<2x8x8xf32> to vector<2x8xf32>
    %87 = vector.shape_cast %86 : vector<2x8xf32> to vector<2x8x1xf32>
    %88 = tpu.reciprocal %87 {approx = true} : vector<2x8x1xf32> -> vector<2x8x1xf32>
    "tpu.trace_start"() <{level = 10 : i32, message = "bqk,bkd->bqd"}> : () -> ()
    %cst_36 = arith.constant dense<0.000000e+00> : vector<2x8x4xf32>
    %89 = tpu.matmul %85, %79, %cst_36 {dimension_numbers = #tpu.dot_dimension_numbers<[2], [1], [1], [2], [0, 0, 0, 1, 1, 2], [0], [0]>} : vector<2x8x8xf32>, vector<2x8x4xf32>, vector<2x8x4xf32> -> vector<2x8x4xf32>
    "tpu.trace_stop"() : () -> ()
    %90 = vector.broadcast %88 : vector<2x8x1xf32> to vector<2x8x4xf32>
    %91 = arith.mulf %89, %90 : vector<2x8x4xf32>
    %92 = vector.shape_cast %91 : vector<2x8x4xf32> to vector<16x4xf32>
    %c12 = arith.constant 12 : index
    %c0_37 = arith.constant 0 : index
    %93 = vector.load %arg3[%c12, %c0_37] : memref<32x32xf32, #tpu.memory_space<vmem>>, vector<4x32xf32>
    %cst_38 = arith.constant dense<0.000000e+00> : vector<16x32xf32>
    %94 = tpu.matmul %92, %93, %cst_38 {dimension_numbers = #tpu.dot_dimension_numbers<[1], [0], [0], [1], [0, 0, 1, 1], [], []>} : vector<16x4xf32>, vector<4x32xf32>, vector<16x32xf32> -> vector<16x32xf32>
    %c0_39 = arith.constant 0 : index
    %c0_40 = arith.constant 0 : index
    %95 = vector.load %arg6[%c0_39, %c0_40] : memref<16x32xf32, #tpu.memory_space<vmem>>, vector<16x32xf32>
    %96 = arith.addf %95, %94 : vector<16x32xf32>
    %c0_41 = arith.constant 0 : index
    %c0_42 = arith.constant 0 : index
    %97 = vector.load %arg6[%c0_41, %c0_42] : memref<16x32xf32, #tpu.memory_space<vmem>>, vector<16x32xf32>
    tpu.vector_store %arg6[%c0_41, %c0_42], %96 {strides = array<i32>} : memref<16x32xf32, #tpu.memory_space<vmem>>, vector<16x32xf32>,
    %98 = vector.extract_strided_slice %3 {offsets = [0, 16], sizes = [16, 4], strides = [1, 1]} : vector<16x96xf32> to vector<16x4xf32>
    %99 = vector.shape_cast %98 : vector<16x4xf32> to vector<2x8x4xf32>
    %100 = vector.extract_strided_slice %3 {offsets = [0, 48], sizes = [16, 4], strides = [1, 1]} : vector<16x96xf32> to vector<16x4xf32>
    %101 = vector.shape_cast %100 : vector<16x4xf32> to vector<2x8x4xf32>
    %102 = vector.extract_strided_slice %3 {offsets = [0, 80], sizes = [16, 4], strides = [1, 1]} : vector<16x96xf32> to vector<16x4xf32>
    %103 = vector.shape_cast %102 : vector<16x4xf32> to vector<2x8x4xf32>
    "tpu.trace_start"() <{level = 10 : i32, message = "bqd,bkd->bqk"}> : () -> ()
    %cst_43 = arith.constant dense<0.000000e+00> : vector<2x8x8xf32>
    %104 = tpu.matmul %99, %101, %cst_43 {dimension_numbers = #tpu.dot_dimension_numbers<[2], [2], [1], [1], [0, 0, 0, 1, 1, 1], [0], [0]>} : vector<2x8x4xf32>, vector<2x8x4xf32>, vector<2x8x8xf32> -> vector<2x8x8xf32>
    "tpu.trace_stop"() : () -> ()
    %cst_44 = arith.constant dense<0xFF800000> : vector<2x8xf32>
    %105 = vector.multi_reduction <maximumf>, %104, %cst_44 [2] : vector<2x8x8xf32> to vector<2x8xf32>
    %106 = vector.shape_cast %105 : vector<2x8xf32> to vector<2x8x1xf32>
    %107 = vector.broadcast %106 : vector<2x8x1xf32> to vector<2x8x8xf32>
    %108 = arith.subf %104, %107 : vector<2x8x8xf32>
    %109 = math.exp %108 : vector<2x8x8xf32>
    %cst_45 = arith.constant dense<0.000000e+00> : vector<2x8xf32>
    %110 = vector.multi_reduction <add>, %109, %cst_45 [2] : vector<2x8x8xf32> to vector<2x8xf32>
    %111 = vector.shape_cast %110 : vector<2x8xf32> to vector<2x8x1xf32>
    %112 = tpu.reciprocal %111 {approx = true} : vector<2x8x1xf32> -> vector<2x8x1xf32>
    "tpu.trace_start"() <{level = 10 : i32, message = "bqk,bkd->bqd"}> : () -> ()
    %cst_46 = arith.constant dense<0.000000e+00> : vector<2x8x4xf32>
    %113 = tpu.matmul %109, %103, %cst_46 {dimension_numbers = #tpu.dot_dimension_numbers<[2], [1], [1], [2], [0, 0, 0, 1, 1, 2], [0], [0]>} : vector<2x8x8xf32>, vector<2x8x4xf32>, vector<2x8x4xf32> -> vector<2x8x4xf32>
    "tpu.trace_stop"() : () -> ()
    %114 = vector.broadcast %112 : vector<2x8x1xf32> to vector<2x8x4xf32>
    %115 = arith.mulf %113, %114 : vector<2x8x4xf32>
    %116 = vector.shape_cast %115 : vector<2x8x4xf32> to vector<16x4xf32>
    %c16 = arith.constant 16 : index
    %c0_47 = arith.constant 0 : index
    %117 = vector.load %arg3[%c16, %c0_47] : memref<32x32xf32, #tpu.memory_space<vmem>>, vector<4x32xf32>
    %cst_48 = arith.constant dense<0.000000e+00> : vector<16x32xf32>
    %118 = tpu.matmul %116, %117, %cst_48 {dimension_numbers = #tpu.dot_dimension_numbers<[1], [0], [0], [1], [0, 0, 1, 1], [], []>} : vector<16x4xf32>, vector<4x32xf32>, vector<16x32xf32> -> vector<16x32xf32>
    %c0_49 = arith.constant 0 : index
    %c0_50 = arith.constant 0 : index
    %119 = vector.load %arg6[%c0_49, %c0_50] : memref<16x32xf32, #tpu.memory_space<vmem>>, vector<16x32xf32>
    %120 = arith.addf %119, %118 : vector<16x32xf32>
    %c0_51 = arith.constant 0 : index
    %c0_52 = arith.constant 0 : index
    %121 = vector.load %arg6[%c0_51, %c0_52] : memref<16x32xf32, #tpu.memory_space<vmem>>, vector<16x32xf32>
    tpu.vector_store %arg6[%c0_51, %c0_52], %120 {strides = array<i32>} : memref<16x32xf32, #tpu.memory_space<vmem>>, vector<16x32xf32>,
    %122 = vector.extract_strided_slice %3 {offsets = [0, 20], sizes = [16, 4], strides = [1, 1]} : vector<16x96xf32> to vector<16x4xf32>
    %123 = vector.shape_cast %122 : vector<16x4xf32> to vector<2x8x4xf32>
    %124 = vector.extract_strided_slice %3 {offsets = [0, 52], sizes = [16, 4], strides = [1, 1]} : vector<16x96xf32> to vector<16x4xf32>
    %125 = vector.shape_cast %124 : vector<16x4xf32> to vector<2x8x4xf32>
    %126 = vector.extract_strided_slice %3 {offsets = [0, 84], sizes = [16, 4], strides = [1, 1]} : vector<16x96xf32> to vector<16x4xf32>
    %127 = vector.shape_cast %126 : vector<16x4xf32> to vector<2x8x4xf32>
    "tpu.trace_start"() <{level = 10 : i32, message = "bqd,bkd->bqk"}> : () -> ()
    %cst_53 = arith.constant dense<0.000000e+00> : vector<2x8x8xf32>
    %128 = tpu.matmul %123, %125, %cst_53 {dimension_numbers = #tpu.dot_dimension_numbers<[2], [2], [1], [1], [0, 0, 0, 1, 1, 1], [0], [0]>} : vector<2x8x4xf32>, vector<2x8x4xf32>, vector<2x8x8xf32> -> vector<2x8x8xf32>
    "tpu.trace_stop"() : () -> ()
    %cst_54 = arith.constant dense<0xFF800000> : vector<2x8xf32>
    %129 = vector.multi_reduction <maximumf>, %128, %cst_54 [2] : vector<2x8x8xf32> to vector<2x8xf32>
    %130 = vector.shape_cast %129 : vector<2x8xf32> to vector<2x8x1xf32>
    %131 = vector.broadcast %130 : vector<2x8x1xf32> to vector<2x8x8xf32>
    %132 = arith.subf %128, %131 : vector<2x8x8xf32>
    %133 = math.exp %132 : vector<2x8x8xf32>
    %cst_55 = arith.constant dense<0.000000e+00> : vector<2x8xf32>
    %134 = vector.multi_reduction <add>, %133, %cst_55 [2] : vector<2x8x8xf32> to vector<2x8xf32>
    %135 = vector.shape_cast %134 : vector<2x8xf32> to vector<2x8x1xf32>
    %136 = tpu.reciprocal %135 {approx = true} : vector<2x8x1xf32> -> vector<2x8x1xf32>
    "tpu.trace_start"() <{level = 10 : i32, message = "bqk,bkd->bqd"}> : () -> ()
    %cst_56 = arith.constant dense<0.000000e+00> : vector<2x8x4xf32>
    %137 = tpu.matmul %133, %127, %cst_56 {dimension_numbers = #tpu.dot_dimension_numbers<[2], [1], [1], [2], [0, 0, 0, 1, 1, 2], [0], [0]>} : vector<2x8x8xf32>, vector<2x8x4xf32>, vector<2x8x4xf32> -> vector<2x8x4xf32>
    "tpu.trace_stop"() : () -> ()
    %138 = vector.broadcast %136 : vector<2x8x1xf32> to vector<2x8x4xf32>
    %139 = arith.mulf %137, %138 : vector<2x8x4xf32>
    %140 = vector.shape_cast %139 : vector<2x8x4xf32> to vector<16x4xf32>
    %c20 = arith.constant 20 : index
    %c0_57 = arith.constant 0 : index
    %141 = vector.load %arg3[%c20, %c0_57] : memref<32x32xf32, #tpu.memory_space<vmem>>, vector<4x32xf32>
    %cst_58 = arith.constant dense<0.000000e+00> : vector<16x32xf32>
    %142 = tpu.matmul %140, %141, %cst_58 {dimension_numbers = #tpu.dot_dimension_numbers<[1], [0], [0], [1], [0, 0, 1, 1], [], []>} : vector<16x4xf32>, vector<4x32xf32>, vector<16x32xf32> -> vector<16x32xf32>
    %c0_59 = arith.constant 0 : index
    %c0_60 = arith.constant 0 : index
    %143 = vector.load %arg6[%c0_59, %c0_60] : memref<16x32xf32, #tpu.memory_space<vmem>>, vector<16x32xf32>
    %144 = arith.addf %143, %142 : vector<16x32xf32>
    %c0_61 = arith.constant 0 : index
    %c0_62 = arith.constant 0 : index
    %145 = vector.load %arg6[%c0_61, %c0_62] : memref<16x32xf32, #tpu.memory_space<vmem>>, vector<16x32xf32>
    tpu.vector_store %arg6[%c0_61, %c0_62], %144 {strides = array<i32>} : memref<16x32xf32, #tpu.memory_space<vmem>>, vector<16x32xf32>,
    %146 = vector.extract_strided_slice %3 {offsets = [0, 24], sizes = [16, 4], strides = [1, 1]} : vector<16x96xf32> to vector<16x4xf32>
    %147 = vector.shape_cast %146 : vector<16x4xf32> to vector<2x8x4xf32>
    %148 = vector.extract_strided_slice %3 {offsets = [0, 56], sizes = [16, 4], strides = [1, 1]} : vector<16x96xf32> to vector<16x4xf32>
    %149 = vector.shape_cast %148 : vector<16x4xf32> to vector<2x8x4xf32>
    %150 = vector.extract_strided_slice %3 {offsets = [0, 88], sizes = [16, 4], strides = [1, 1]} : vector<16x96xf32> to vector<16x4xf32>
    %151 = vector.shape_cast %150 : vector<16x4xf32> to vector<2x8x4xf32>
    "tpu.trace_start"() <{level = 10 : i32, message = "bqd,bkd->bqk"}> : () -> ()
    %cst_63 = arith.constant dense<0.000000e+00> : vector<2x8x8xf32>
    %152 = tpu.matmul %147, %149, %cst_63 {dimension_numbers = #tpu.dot_dimension_numbers<[2], [2], [1], [1], [0, 0, 0, 1, 1, 1], [0], [0]>} : vector<2x8x4xf32>, vector<2x8x4xf32>, vector<2x8x8xf32> -> vector<2x8x8xf32>
    "tpu.trace_stop"() : () -> ()
    %cst_64 = arith.constant dense<0xFF800000> : vector<2x8xf32>
    %153 = vector.multi_reduction <maximumf>, %152, %cst_64 [2] : vector<2x8x8xf32> to vector<2x8xf32>
    %154 = vector.shape_cast %153 : vector<2x8xf32> to vector<2x8x1xf32>
    %155 = vector.broadcast %154 : vector<2x8x1xf32> to vector<2x8x8xf32>
    %156 = arith.subf %152, %155 : vector<2x8x8xf32>
    %157 = math.exp %156 : vector<2x8x8xf32>
    %cst_65 = arith.constant dense<0.000000e+00> : vector<2x8xf32>
    %158 = vector.multi_reduction <add>, %157, %cst_65 [2] : vector<2x8x8xf32> to vector<2x8xf32>
    %159 = vector.shape_cast %158 : vector<2x8xf32> to vector<2x8x1xf32>
    %160 = tpu.reciprocal %159 {approx = true} : vector<2x8x1xf32> -> vector<2x8x1xf32>
    "tpu.trace_start"() <{level = 10 : i32, message = "bqk,bkd->bqd"}> : () -> ()
    %cst_66 = arith.constant dense<0.000000e+00> : vector<2x8x4xf32>
    %161 = tpu.matmul %157, %151, %cst_66 {dimension_numbers = #tpu.dot_dimension_numbers<[2], [1], [1], [2], [0, 0, 0, 1, 1, 2], [0], [0]>} : vector<2x8x8xf32>, vector<2x8x4xf32>, vector<2x8x4xf32> -> vector<2x8x4xf32>
    "tpu.trace_stop"() : () -> ()
    %162 = vector.broadcast %160 : vector<2x8x1xf32> to vector<2x8x4xf32>
    %163 = arith.mulf %161, %162 : vector<2x8x4xf32>
    %164 = vector.shape_cast %163 : vector<2x8x4xf32> to vector<16x4xf32>
    %c24 = arith.constant 24 : index
    %c0_67 = arith.constant 0 : index
    %165 = vector.load %arg3[%c24, %c0_67] : memref<32x32xf32, #tpu.memory_space<vmem>>, vector<4x32xf32>
    %cst_68 = arith.constant dense<0.000000e+00> : vector<16x32xf32>
    %166 = tpu.matmul %164, %165, %cst_68 {dimension_numbers = #tpu.dot_dimension_numbers<[1], [0], [0], [1], [0, 0, 1, 1], [], []>} : vector<16x4xf32>, vector<4x32xf32>, vector<16x32xf32> -> vector<16x32xf32>
    %c0_69 = arith.constant 0 : index
    %c0_70 = arith.constant 0 : index
    %167 = vector.load %arg6[%c0_69, %c0_70] : memref<16x32xf32, #tpu.memory_space<vmem>>, vector<16x32xf32>
    %168 = arith.addf %167, %166 : vector<16x32xf32>
    %c0_71 = arith.constant 0 : index
    %c0_72 = arith.constant 0 : index
    %169 = vector.load %arg6[%c0_71, %c0_72] : memref<16x32xf32, #tpu.memory_space<vmem>>, vector<16x32xf32>
    tpu.vector_store %arg6[%c0_71, %c0_72], %168 {strides = array<i32>} : memref<16x32xf32, #tpu.memory_space<vmem>>, vector<16x32xf32>,
    %170 = vector.extract_strided_slice %3 {offsets = [0, 28], sizes = [16, 4], strides = [1, 1]} : vector<16x96xf32> to vector<16x4xf32>
    %171 = vector.shape_cast %170 : vector<16x4xf32> to vector<2x8x4xf32>
    %172 = vector.extract_strided_slice %3 {offsets = [0, 60], sizes = [16, 4], strides = [1, 1]} : vector<16x96xf32> to vector<16x4xf32>
    %173 = vector.shape_cast %172 : vector<16x4xf32> to vector<2x8x4xf32>
    %174 = vector.extract_strided_slice %3 {offsets = [0, 92], sizes = [16, 4], strides = [1, 1]} : vector<16x96xf32> to vector<16x4xf32>
    %175 = vector.shape_cast %174 : vector<16x4xf32> to vector<2x8x4xf32>
    "tpu.trace_start"() <{level = 10 : i32, message = "bqd,bkd->bqk"}> : () -> ()
    %cst_73 = arith.constant dense<0.000000e+00> : vector<2x8x8xf32>
    %176 = tpu.matmul %171, %173, %cst_73 {dimension_numbers = #tpu.dot_dimension_numbers<[2], [2], [1], [1], [0, 0, 0, 1, 1, 1], [0], [0]>} : vector<2x8x4xf32>, vector<2x8x4xf32>, vector<2x8x8xf32> -> vector<2x8x8xf32>
    "tpu.trace_stop"() : () -> ()
    %cst_74 = arith.constant dense<0xFF800000> : vector<2x8xf32>
    %177 = vector.multi_reduction <maximumf>, %176, %cst_74 [2] : vector<2x8x8xf32> to vector<2x8xf32>
    %178 = vector.shape_cast %177 : vector<2x8xf32> to vector<2x8x1xf32>
    %179 = vector.broadcast %178 : vector<2x8x1xf32> to vector<2x8x8xf32>
    %180 = arith.subf %176, %179 : vector<2x8x8xf32>
    %181 = math.exp %180 : vector<2x8x8xf32>
    %cst_75 = arith.constant dense<0.000000e+00> : vector<2x8xf32>
    %182 = vector.multi_reduction <add>, %181, %cst_75 [2] : vector<2x8x8xf32> to vector<2x8xf32>
    %183 = vector.shape_cast %182 : vector<2x8xf32> to vector<2x8x1xf32>
    %184 = tpu.reciprocal %183 {approx = true} : vector<2x8x1xf32> -> vector<2x8x1xf32>
    "tpu.trace_start"() <{level = 10 : i32, message = "bqk,bkd->bqd"}> : () -> ()
    %cst_76 = arith.constant dense<0.000000e+00> : vector<2x8x4xf32>
    %185 = tpu.matmul %181, %175, %cst_76 {dimension_numbers = #tpu.dot_dimension_numbers<[2], [1], [1], [2], [0, 0, 0, 1, 1, 2], [0], [0]>} : vector<2x8x8xf32>, vector<2x8x4xf32>, vector<2x8x4xf32> -> vector<2x8x4xf32>
    "tpu.trace_stop"() : () -> ()
    %186 = vector.broadcast %184 : vector<2x8x1xf32> to vector<2x8x4xf32>
    %187 = arith.mulf %185, %186 : vector<2x8x4xf32>
    %188 = vector.shape_cast %187 : vector<2x8x4xf32> to vector<16x4xf32>
    %c28 = arith.constant 28 : index
    %c0_77 = arith.constant 0 : index
    %189 = vector.load %arg3[%c28, %c0_77] : memref<32x32xf32, #tpu.memory_space<vmem>>, vector<4x32xf32>
    %cst_78 = arith.constant dense<0.000000e+00> : vector<16x32xf32>
    %190 = tpu.matmul %188, %189, %cst_78 {dimension_numbers = #tpu.dot_dimension_numbers<[1], [0], [0], [1], [0, 0, 1, 1], [], []>} : vector<16x4xf32>, vector<4x32xf32>, vector<16x32xf32> -> vector<16x32xf32>
    %c0_79 = arith.constant 0 : index
    %c0_80 = arith.constant 0 : index
    %191 = vector.load %arg6[%c0_79, %c0_80] : memref<16x32xf32, #tpu.memory_space<vmem>>, vector<16x32xf32>
    %192 = arith.addf %191, %190 : vector<16x32xf32>
    %c0_81 = arith.constant 0 : index
    %c0_82 = arith.constant 0 : index
    %193 = vector.load %arg6[%c0_81, %c0_82] : memref<16x32xf32, #tpu.memory_space<vmem>>, vector<16x32xf32>
    tpu.vector_store %arg6[%c0_81, %c0_82], %192 {strides = array<i32>} : memref<16x32xf32, #tpu.memory_space<vmem>>, vector<16x32xf32>,
    %c0_83 = arith.constant 0 : index
    %c0_84 = arith.constant 0 : index
    %194 = vector.load %arg6[%c0_83, %c0_84] : memref<16x32xf32, #tpu.memory_space<vmem>>, vector<16x32xf32>
    %c0_85 = arith.constant 0 : index
    %c0_86 = arith.constant 0 : index
    %195 = vector.load %arg4[%c0_85, %c0_86] : memref<1x32xf32, #tpu.memory_space<vmem>>, vector<1x32xf32>
    %196 = vector.broadcast %195 : vector<1x32xf32> to vector<16x32xf32>
    %197 = arith.addf %194, %196 : vector<16x32xf32>
    %198 = vector.shape_cast %197 : vector<16x32xf32> to vector<2x8x32xf32>
    %c0_87 = arith.constant 0 : index
    %c0_88 = arith.constant 0 : index
    %c0_89 = arith.constant 0 : index
    %199 = vector.load %arg5[%c0_87, %c0_88, %c0_89] : memref<2x8x32xf32, #tpu.memory_space<vmem>>, vector<2x8x32xf32>
    tpu.vector_store %arg5[%c0_87, %c0_88, %c0_89], %198 {strides = array<i32>} : memref<2x8x32xf32, #tpu.memory_space<vmem>>, vector<2x8x32xf32>,
    return
  }
  func.func @transform_0(%arg0: i32) -> (i32, i32, i32) {
    %c0_i32 = arith.constant 0 : i32
    %c0_i32_0 = arith.constant 0 : i32
    %c0_i32_1 = arith.constant 0 : i32
    return %arg0, %c0_i32, %c0_i32_0 : i32, i32, i32
  }
  func.func @transform_1(%arg0: i32) -> (i32, i32) {
    %c0_i32 = arith.constant 0 : i32
    %c0_i32_0 = arith.constant 0 : i32
    %c0_i32_1 = arith.constant 0 : i32
    return %c0_i32, %c0_i32_0 : i32, i32
  }
  func.func @transform_2(%arg0: i32) -> (i32, i32) {
    %c0_i32 = arith.constant 0 : i32
    %c0_i32_0 = arith.constant 0 : i32
    %c0_i32_1 = arith.constant 0 : i32
    return %c0_i32, %c0_i32_0 : i32, i32
  }
  func.func @transform_3(%arg0: i32) -> (i32, i32) {
    %c0_i32 = arith.constant 0 : i32
    %c0_i32_0 = arith.constant 0 : i32
    %c0_i32_1 = arith.constant 0 : i32
    return %c0_i32, %c0_i32_0 : i32, i32
  }
  func.func @transform_4(%arg0: i32) -> (i32, i32, i32) {
    %c0_i32 = arith.constant 0 : i32
    %c0_i32_0 = arith.constant 0 : i32
    %c0_i32_1 = arith.constant 0 : i32
    return %arg0, %c0_i32, %c0_i32_0 : i32, i32, i32
  }
}

</mosaic_0001>

<bundles_post_ra>
// kernel: tpu_custom_call.1
= control target key start
LH: loop header
LB: loop body
LE: loop exit
PB: predicated region body
PF: predicated region fallthrough
CT: control target
= control target key end

     0   :  { %9 = vsyncpa [#allocation4], 0  ;;  %s4536_s0 = inlined_call_operand.hbm [shape: f32[2,8,32], index: 0, kind: input, shape index: {}]   ;;  %s4537_s1 = inlined_call_operand.hbm [shape: f32[32,96], index: 1, kind: input, shape index: {}]   ;;  %s4538_s2 = inlined_call_operand.hbm [shape: f32[32,32], index: 2, kind: input, shape index: {}]   ;;  %s4539_s3 = inlined_call_operand.vmem [shape: f32[1,32], index: 3, kind: input, shape index: {}]   ;;  %s4540_s4 = inlined_call_operand.hbm [shape: f32[2,8,32], index: 4, kind: output, shape index: {}]  }
   0x1   :  { %10 = vsyncpa [#allocation7], 0 }
   0x2   :  { %11 = vsyncpa [#allocation5], 0  ;;  %s4120_s15 = smov [#allocation6]   ;;  %s4121_s17 = smov [#allocation3]  }
   0x3   :  { %s29_s16 = sshll.u32 %s4120_s15, 4  ;;  %s17_s18 = sshll.u32 %s4121_s17, 4  ;;  %s30_s16 = int_to_ptr.vmem [resolvable:$true] %s29_s16  ;;  %s4176_s18 = int_to_ptr.vmem [resolvable:$true] %s17_s18 }
   0x4   :  { %s4026_s21 = scalar_lea.hbm %s4537_s1, 512 }
   0x5   :  { %p4027_p0 = scmp.ne.s32.totalorder %s4537_s1, %s4026_s21  ;;  %p4030_p1 = scmp.lt.u32.totalorder %s4026_s21, %s4537_s1 }
   0x7   :  { %p4032_p2 = pnand %p4030_p1, %p4027_p0 }
   0x9   :  { %4035 = shalt.err (!%p4032_p2)
}
   0xa   :  { %s4036_s26 = scalar_lea.vmem %s30_s16, 512  ;;  %p4041_p4 = scmp.lt.s32.totalorder %s30_s16, %s30_s16 }
   0xb   :  { %p4037_p3 = scmp.ne.s32.totalorder %s30_s16, %s4036_s26  ;;  %p4042_p5 = scmp.lt.s32.totalorder %s4036_s26, %s4036_s26 }
   0xd   :  { %p4043_p6 = por %p4042_p5, %p4041_p4 }
   0xf   :  { %p4044_p7 = pnand %p4043_p6, %p4037_p3 }
  0x11   :  { %4047 = shalt.err (!%p4044_p7)
}
  0x12   :  { %s4122_s27 = smov 128   ;;  %s4123_s28 = smov 8  }
  0x13   :  { %35 = dma.hbm_to_vmem [thread:$0]  %s4537_s1, 512, %s30_s16, [#allocation7], %s4122_s27, %s4122_s27, %s4123_s28  }
  0x14   :  { %s4048_s7 = scalar_lea.hbm %s4536_s0, 256 }
  0x15   :  { %p4049_p8 = scmp.ne.s32.totalorder %s4536_s0, %s4048_s7  ;;  %p4052_p9 = scmp.lt.u32.totalorder %s4048_s7, %s4536_s0 }
  0x17   :  { %p4054_p10 = pnand %p4052_p9, %p4049_p8 }
  0x19   :  { %4057 = shalt.err (!%p4054_p10)
}
  0x1a   :  { %s4058_s12 = scalar_lea.vmem %s4176_s18, 256  ;;  %p4063_p12 = scmp.lt.s32.totalorder %s4176_s18, %s4176_s18 }
  0x1b   :  { %p4059_p11 = scmp.ne.s32.totalorder %s4176_s18, %s4058_s12  ;;  %p4064_p13 = scmp.lt.s32.totalorder %s4058_s12, %s4058_s12 }
  0x1d   :  { %p4065_p0 = por %p4064_p13, %p4063_p12 }
  0x1f   :  { %p4066_p1 = pnand %p4065_p0, %p4059_p11 }
  0x21   :  { %4069 = shalt.err (!%p4066_p1)
}
  0x22   :  { %23 = dma.hbm_to_vmem [thread:$0]  %s4536_s0, 256, %s4176_s18, [#allocation4], %s4122_s27, %s4122_s27, %s4123_s28  }
  0x23   :  { %s4124_s14 = smov [#allocation8]   ;;  %s4070_s19 = scalar_lea.hbm %s4538_s2, 512 }
  0x24   :  { %s41_s15 = sshll.u32 %s4124_s14, 4  ;;  %p4071_p2 = scmp.ne.s32.totalorder %s4538_s2, %s4070_s19  ;;  %s42_s15 = int_to_ptr.vmem [resolvable:$true] %s41_s15 }
  0x25   :  { %p4074_p3 = scmp.lt.u32.totalorder %s4070_s19, %s4538_s2 }
  0x27   :  { %p4076_p4 = pnand %p4074_p3, %p4071_p2 }
  0x29   :  { %4079 = shalt.err (!%p4076_p4)
}
  0x2a   :  { %s4080_s24 = scalar_lea.vmem %s42_s15, 512  ;;  %p4085_p6 = scmp.lt.s32.totalorder %s42_s15, %s42_s15 }
  0x2b   :  { %p4081_p5 = scmp.ne.s32.totalorder %s42_s15, %s4080_s24  ;;  %p4086_p7 = scmp.lt.s32.totalorder %s4080_s24, %s4080_s24 }
  0x2d   :  { %p4087_p8 = por %p4086_p7, %p4085_p6 }
  0x2f   :  { %p4088_p9 = pnand %p4087_p8, %p4081_p5 }
  0x31   :  { %4091 = shalt.err (!%p4088_p9)
}
  0x32   :  { %47 = dma.hbm_to_vmem [thread:$0]  %s4538_s2, 512, %s42_s15, [#allocation7], %s4122_s27, %s4122_s27, %s4123_s28  }
  0x33   :  { %4114 = dma.done.wait [#allocation4], 256  }
  0x34   :  { %4115 = vsyncadd [#allocation4], 4294967040 }
  0x35   :  { %4116 = dma.done.wait [#allocation7], 1024  }
  0x36   :  { %4117 = vsyncadd [#allocation7], 4294966272  ;;  %vm65_vm0 = vcmask 261120   ;;  %v61_v0 = vld [vmem:[#allocation6] sm:$0xff]  ;;  %v62_v1 = vld [vmem:[#allocation6 + $0x8] sm:$0xff]  ;;  %v4125_v8 = vmov 0.0  }
  0x37   :  { %v63_v2 = vld [vmem:[#allocation6 + $0x10] sm:$0xff]  ;;  %v3923_v3 = vpack.c.bf16 %v62_v1, %v61_v0  ;;  %v64_v4 = vld [vmem:[#allocation6 + $0x18] sm:$0xff]  ;;  %3723 = vmatprep.subr.mxu1 %v4125_v8  ;;  %vm4126_vm1 = vmmov 0   ;;  %s4127_s2 = smov 96   ;;  %s4128_s25 = smov 64   ;;  %vm150_vm2 = vcmask 31744  }
  0x38   :  { %v59_v5 = vld [vmem:[#allocation3] sm:$0xff]  ;;  %v3927_v6 = vpack.c.bf16 %v64_v4, %v63_v2  ;;  %v60_v7 = vld [vmem:[#allocation3 + $0x8] sm:$0xff]  ;;  %3725 = vmatprep.mubr.msk.f32.mxu1 %vm4126_vm1, %v4125_v8  ;;  %s4129_s26 = smov 92   ;;  %vm302_vm3 = vcmask 64512   ;;  %v477_v32 = vld [vmem:[#allocation8] sm:$0xf] }
  0x39   :  { %3720 = vmatprep.mubr.msk.f32.mxu0 %vm65_vm0, %v59_v5  ;;  %3924 = vmatprep.subr.bf16.mxu0 %v3923_v3  ;;  %vm484_vm4 = vcmask 1043456   ;;  %s4130_s29 = smov 124   ;;  %s4131_s30 = smov 60   ;;  %v895_v2 = vld [vmem:[#allocation8 + $0x4] sm:$0xf] }
  0x3a   :  { %3926 = vmatpush3.bf16.msra.mxu0 %v3923_v3  ;;  %s4132_s5 = smov 88   ;;  %s4133_s6 = smov 120  }
  0x3b   :  { %3928 = vmatprep.subr.bf16.mxu0 %v3927_v6  ;;  %s4134_s7 = smov 56   ;;  %s4135_s8 = smov 84  }
  0x3c   :  { %s4136_s9 = smov 116   ;;  %s4137_s10 = smov 52  }
  0x3d   :  { %s4138_s11 = smov 80   ;;  %s4139_s12 = smov 112  }
  0x3e   :  { %3930 = vmatpush3.bf16.msra.mxu0 %v3927_v6  ;;  %s4140_s1 = smov 48   ;;  %s4141_s13 = smov 76  }
  0x3f   :  { %3733 = vmatprep.subr.mxu0 %v4125_v8  ;;  %s4142_s14 = smov 108   ;;  %s4143_s15 = smov 44  }
  0x40   :  { %s4144_s16 = smov 72   ;;  %s4145_s17 = smov 104  }
  0x41   :  { %3721 = vmatmul.mubr.msk.f32.vlgmr.msra.gmra.mrb[0].mxu0 %vm65_vm0, %v60_v7  ;;  %s4146_s19 = smov 40   ;;  %s4147_s20 = smov 68  }
  0x42   :  { %3735 = vmatprep.mubr.msk.f32.mxu0 %vm4126_vm1, %v4125_v8  ;;  %s4148_s21 = smov 100   ;;  %s4149_s22 = smov 36  }
  0x43   :  { %s4150_s0 = smov [#allocation9]  }
  0x44   :  { %s3530_s18 = sshll.u32 %s4150_s0, 4  ;;  %s3531_s18 = int_to_ptr.vmem [resolvable:$true] %s3530_s18 }
  0x45   :  { %p4097_p11 = scmp.lt.s32.totalorder %s3531_s18, %s3531_s18 }
 0x114   :  { %v4236_v9 = vpop.f32.mrb[0].mxu0 }
 0x115   :  { %v4238_v10 = vpop.f32.mrb[1].mxu0 }
 0x116   :  { %148 = vrot.lane.b32.xlu0 %v4238_v10, %s4127_s2 }
 0x11a   :  { %226 = vrot.lane.b32.xlu0 %v4236_v9, %s4127_s2  ;;  %s4092_s2 = scalar_lea.vmem %s3531_s18, 256 }
 0x11b   :  { %p4093_p10 = scmp.ne.s32.totalorder %s3531_s18, %s4092_s2  ;;  %p4098_p12 = scmp.lt.s32.totalorder %s4092_s2, %s4092_s2 }
 0x11d   :  { %p4099_p13 = por %p4098_p12, %p4097_p11 }
 0x11e   :  { %323 = vrot.lane.b32.xlu0 %v4238_v10, %s4128_s25 }
 0x11f   :  { %p4100_p0 = pnand %p4099_p13, %p4093_p10 }
 0x122   :  { %567 = vrot.lane.b32.xlu0 %v4238_v10, %s4129_s26 }
 0x188   :  { %v149_v11 = vpop.permute.xlu0 %148 }
 0x189   :  { %3724 = vmatpush3.xpose.msk.msra.mxu1 %vm150_vm2, %v149_v11 }
 0x18a   :  { %3728 = vmatprep.subr.mxu1 %v4125_v8 }
 0x18c   :  { %3726 = vmatmul.mubr.msk.f32.vlgmr.msra.gmra.mrb[0].mxu1 %vm150_vm2, %v4238_v10  ;;  %v227_v12 = vpop.permute.xlu0 %226 }
 0x18d   :  { %3729 = vmatpush3.xpose.msk.msra.mxu1 %vm150_vm2, %v227_v12  ;;  %3730 = vmatprep.mubr.msk.f32.mxu1 %vm4126_vm1, %v4125_v8 }
 0x18e   :  { %3738 = vmatprep.subr.mxu1 %v4125_v8 }
 0x190   :  { %3731 = vmatmul.mubr.msk.f32.vlgmr.msra.gmra.mrb[2].mxu1 %vm150_vm2, %v4236_v9  ;;  %v324_v13 = vpop.permute.xlu0 %323 }
 0x191   :  { %3734 = vmatpush3.msra.mxu0 %v324_v13  ;;  %3740 = vmatprep.mubr.msk.f32.mxu1 %vm4126_vm1, %v4125_v8 }
 0x192   :  { %3743 = vmatprep.subr.msk.mxu0 %vm484_vm4, %v477_v32 }
 0x194   :  { %v568_v30 = vpop.permute.xlu0 %567 }
 0x25f   :  { %v221_v14 = vpop.f32.mrb[0].mxu1 }
 0x260   :  { %v3727_v15 = vpop.f32.mrb[1].mxu1  ;;  %v303_v16 = vsel %vm302_vm3, %v221_v14, -inf }
 0x261   :  { %304 = vmax.xlane.f32.xlu1 %v303_v16 }
 0x263   :  { %v298_v17 = vpop.f32.mrb[2].mxu1 }
 0x264   :  { %v3732_v18 = vpop.f32.mrb[3].mxu1  ;;  %v306_v19 = vsel %vm302_vm3, %v298_v17, -inf }
 0x265   :  { %307 = vmax.xlane.f32.xlu1 %v306_v19 }
 0x276   :  { %399 = vrot.lane.b32.xlu1 %v4236_v9, %s4128_s25 }
 0x2ee   :  { %v305_v20 = vpop.xlane.xlu1 %304 }
 0x2ef   :  { %v309_v21 = vsub.f32 %v221_v14, %v305_v20 }
 0x2f1   :  { %v311_v22 = vmul.f32 1.442695, %v309_v21 }
 0x2f2   :  { %v308_v23 = vpop.xlane.xlu1 %307 }
 0x2f3   :  { %3962 = vpow2.f32 %v311_v22  ;;  %v310_v24 = vsub.f32 %v298_v17, %v308_v23 }
 0x2f5   :  { %v313_v25 = vmul.f32 1.442695, %v310_v24 }
 0x2f6   :  { %v400_v26 = vpop.permute.xlu1 %399 }
 0x2f7   :  { %3964 = vpow2.f32 %v313_v25  ;;  %3739 = vmatpush3.msra.mxu1 %v400_v26 }
 0x2f8   :  { %3748 = vmatprep.subr.mxu1 %v4125_v8 }
 0x2fd   :  { %v3963_v27 = vpop.eup %3962 }
 0x2fe   :  { %3736 = vmatmul.mubr.msk.f32.vlgmr.msra.gmra.mrb[2].mxu0 %vm302_vm3, %v3963_v27  ;;  %v315_v28 = vsel %vm302_vm3, %v3963_v27, 0.0 }
 0x2ff   :  { %316 = vadd.xlane.f32.xlu0 %v315_v28  ;;  %3744 = vmatpush3.msk.msra.mxu0 %vm484_vm4, %v477_v32 }
 0x300   :  { %3753 = vmatprep.subr.mxu0 %v4125_v8 }
 0x301   :  { %v3965_v29 = vpop.eup %3964 }
 0x302   :  { %3741 = vmatmul.mubr.msk.f32.vlgmr.msra.gmra.mrb[4].mxu1 %vm302_vm3, %v3965_v29  ;;  %v318_v31 = vsel %vm302_vm3, %v3965_v29, 0.0 }
 0x303   :  { %3749 = vmatpush3.xpose.msk.msra.mxu1 %vm150_vm2, %v568_v30  ;;  %319 = vadd.xlane.f32.xlu1 %v318_v31 }
 0x304   :  { %3750 = vmatprep.mubr.msk.f32.mxu1 %vm4126_vm1, %v4125_v8  ;;  %3758 = vmatprep.subr.mxu1 %v4125_v8 }
 0x314   :  { %645 = vrot.lane.b32.xlu1 %v4236_v9, %s4129_s26 }
 0x315   :  { %565 = vrot.lane.b32.xlu0 %v4238_v10, %s4130_s29 }
 0x319   :  { %643 = vrot.lane.b32.xlu0 %v4236_v9, %s4130_s29 }
 0x38c   :  { %v317_v33 = vpop.xlane.xlu0 %316 }
 0x38d   :  { %3966 = vrcp.f32 %v317_v33 }
 0x390   :  { %v566_v34 = vpop.permute.xlu0 %565  ;;  %v320_v35 = vpop.xlane.xlu1 %319 }
 0x391   :  { %3751 = vmatmul.mubr.msk.f32.vlgmr.msra.gmra.mrb[6].mxu1 %vm150_vm2, %v566_v34  ;;  %3968 = vrcp.f32 %v320_v35 }
 0x392   :  { %3760 = vmatprep.mubr.msk.f32.mxu1 %vm4126_vm1, %v4125_v8 }
 0x394   :  { %v646_v44 = vpop.permute.xlu1 %645  ;;  %v644_v45 = vpop.permute.xlu0 %643 }
 0x397   :  { %v3967_v36 = vpop.eup %3966 }
 0x39b   :  { %v3969_v40 = vpop.eup %3968 }
 0x3d1   :  { %v395_v37 = vpop.f32.mrb[2].mxu0 }
 0x3d2   :  { %v475_v38 = vmul.f32 %v3967_v36, %v395_v37  ;;  %v3737_v39 = vpop.f32.mrb[3].mxu0 }
 0x3d4   :  { %3745 = vmatprep.mubr.msk.f32.mxu0 %vm150_vm2, %v475_v38 }
 0x3d5   :  { %v471_v41 = vpop.f32.mrb[4].mxu1 }
 0x3d6   :  { %v476_v42 = vmul.f32 %v3969_v40, %v471_v41  ;;  %v3742_v43 = vpop.f32.mrb[5].mxu1 }
 0x3d8   :  { %3746 = vmatmul.mubr.msk.f32.vlgmr.msra.gmra.mrb[4].mxu0 %vm150_vm2, %v476_v42 }
 0x3d9   :  { %3754 = vmatpush3.xpose.msk.msra.mxu0 %vm150_vm2, %v646_v44  ;;  %3755 = vmatprep.mubr.msk.f32.mxu0 %vm4126_vm1, %v4125_v8 }
 0x3da   :  { %3763 = vmatprep.subr.mxu0 %v4125_v8 }
 0x3dc   :  { %3756 = vmatmul.mubr.msk.f32.vlgmr.msra.gmra.mrb[6].mxu0 %vm150_vm2, %v644_v45 }
 0x3dd   :  { %3765 = vmatprep.mubr.msk.f32.mxu0 %vm4126_vm1, %v4125_v8 }
 0x464   :  { %v639_v46 = vpop.f32.mrb[6].mxu1 }
 0x465   :  { %v3752_v47 = vpop.f32.mrb[7].mxu1  ;;  %v721_v48 = vsel %vm302_vm3, %v639_v46, -inf }
 0x466   :  { %722 = vmax.xlane.f32.xlu0 %v721_v48  ;;  %v1316_v48 = vld [vmem:[#allocation8 + $0x8] sm:$0xf] }
 0x47c   :  { %741 = vrot.lane.b32.xlu0 %v4238_v10, %s4131_s30 }
 0x4ab   :  { %v3747_v49 = vpop.f32.mrb[4].mxu0 }
 0x4ac   :  { %564 = vst.msk [vmem:[#allocation2 + $0x8] sm:$0xff] %vm65_vm0, %v3747_v49  ;;  %v554_v50 = vpop.f32.mrb[5].mxu0 }
 0x4ad   :  { %563 = vst.msk [vmem:[#allocation2] sm:$0xff] %vm65_vm0, %v554_v50 }
 0x4af   :  { %v717_v51 = vpop.f32.mrb[6].mxu0 }
 0x4b0   :  { %v3757_v52 = vpop.f32.mrb[7].mxu0  ;;  %v724_v53 = vsel %vm302_vm3, %v717_v51, -inf }
 0x4b1   :  { %725 = vmax.xlane.f32.xlu1 %v724_v53 }
 0x4b3   :  { %v981_v24 = vld [vmem:[#allocation2 + $0x8] sm:$0xff] }
 0x4b4   :  { %v980_v27 = vld [vmem:[#allocation2] sm:$0xff] }
 0x4c2   :  { %817 = vrot.lane.b32.xlu1 %v4236_v9, %s4131_s30 }
 0x4f3   :  { %v723_v54 = vpop.xlane.xlu0 %722 }
 0x4f4   :  { %v727_v55 = vsub.f32 %v639_v46, %v723_v54 }
 0x4f6   :  { %v729_v56 = vmul.f32 1.442695, %v727_v55 }
 0x4f7   :  { %v742_v57 = vpop.permute.xlu0 %741 }
 0x4f8   :  { %3970 = vpow2.f32 %v729_v56  ;;  %3759 = vmatpush3.msra.mxu1 %v742_v57 }
 0x4f9   :  { %3768 = vmatprep.subr.msk.mxu1 %vm484_vm4, %v895_v2 }
 0x502   :  { %v3971_v58 = vpop.eup %3970 }
 0x503   :  { %3761 = vmatmul.mubr.msk.f32.vlgmr.msra.gmra.mrb[8].mxu1 %vm302_vm3, %v3971_v58  ;;  %v733_v59 = vsel %vm302_vm3, %v3971_v58, 0.0 }
 0x504   :  { %734 = vadd.xlane.f32.xlu0 %v733_v59  ;;  %3769 = vmatpush3.msk.msra.mxu1 %vm484_vm4, %v895_v2 }
 0x505   :  { %3778 = vmatprep.subr.mxu1 %v4125_v8 }
 0x51a   :  { %988 = vrot.lane.b32.xlu0 %v4238_v10, %s4132_s5 }
 0x51e   :  { %986 = vrot.lane.b32.xlu0 %v4238_v10, %s4133_s6 }
 0x522   :  { %1064 = vrot.lane.b32.xlu0 %v4236_v9, %s4133_s6 }
 0x53e   :  { %v726_v60 = vpop.xlane.xlu1 %725 }
 0x53f   :  { %v728_v61 = vsub.f32 %v717_v51, %v726_v60 }
 0x541   :  { %v731_v62 = vmul.f32 1.442695, %v728_v61 }
 0x542   :  { %v818_v63 = vpop.permute.xlu1 %817 }
 0x543   :  { %3972 = vpow2.f32 %v731_v62  ;;  %3764 = vmatpush3.msra.mxu0 %v818_v63 }
 0x544   :  { %3773 = vmatprep.subr.mxu0 %v4125_v8 }
 0x54d   :  { %v3973_v0 = vpop.eup %3972 }
 0x54e   :  { %3766 = vmatmul.mubr.msk.f32.vlgmr.msra.gmra.mrb[8].mxu0 %vm302_vm3, %v3973_v0  ;;  %v736_v1 = vsel %vm302_vm3, %v3973_v0, 0.0 }
 0x54f   :  { %737 = vadd.xlane.f32.xlu1 %v736_v1  ;;  %3775 = vmatprep.mubr.msk.f32.mxu0 %vm4126_vm1, %v4125_v8 }
 0x560   :  { %1066 = vrot.lane.b32.xlu1 %v4236_v9, %s4132_s5 }
 0x591   :  { %v735_v3 = vpop.xlane.xlu0 %734 }
 0x592   :  { %3974 = vrcp.f32 %v735_v3 }
 0x595   :  { %v989_v4 = vpop.permute.xlu0 %988 }
 0x596   :  { %3774 = vmatpush3.xpose.msk.msra.mxu0 %vm150_vm2, %v989_v4 }
 0x597   :  { %3783 = vmatprep.subr.mxu0 %v4125_v8 }
 0x599   :  { %v987_v5 = vpop.permute.xlu0 %986 }
 0x59a   :  { %3776 = vmatmul.mubr.msk.f32.vlgmr.msra.gmra.mrb[10].mxu0 %vm150_vm2, %v987_v5 }
 0x59b   :  { %3785 = vmatprep.mubr.msk.f32.mxu0 %vm4126_vm1, %v4125_v8 }
 0x59c   :  { %v3975_v6 = vpop.eup %3974 }
 0x59d   :  { %v1065_v19 = vpop.permute.xlu0 %1064 }
 0x5d6   :  { %v813_v7 = vpop.f32.mrb[8].mxu1 }
 0x5d7   :  { %v893_v11 = vmul.f32 %v3975_v6, %v813_v7  ;;  %v3762_v12 = vpop.f32.mrb[9].mxu1 }
 0x5d9   :  { %3770 = vmatprep.mubr.msk.f32.mxu1 %vm150_vm2, %v893_v11 }
 0x5dc   :  { %v738_v13 = vpop.xlane.xlu1 %737 }
 0x5dd   :  { %3976 = vrcp.f32 %v738_v13 }
 0x5e0   :  { %v1067_v18 = vpop.permute.xlu1 %1066 }
 0x5e7   :  { %v3977_v14 = vpop.eup %3976 }
 0x621   :  { %v889_v15 = vpop.f32.mrb[8].mxu0 }
 0x622   :  { %v894_v16 = vmul.f32 %v3977_v14, %v889_v15  ;;  %v3767_v17 = vpop.f32.mrb[9].mxu0 }
 0x624   :  { %3771 = vmatmul.mubr.msk.f32.vlgmr.msra.gmra.mrb[10].mxu1 %vm150_vm2, %v894_v16 }
 0x625   :  { %3779 = vmatpush3.xpose.msk.msra.mxu1 %vm150_vm2, %v1067_v18  ;;  %3780 = vmatprep.mubr.msk.f32.mxu1 %vm4126_vm1, %v4125_v8 }
 0x626   :  { %3788 = vmatprep.subr.mxu1 %v4125_v8 }
 0x628   :  { %3781 = vmatmul.mubr.msk.f32.vlgmr.msra.gmra.mrb[12].mxu1 %vm150_vm2, %v1065_v19 }
 0x629   :  { %3790 = vmatprep.mubr.msk.f32.mxu1 %vm4126_vm1, %v4125_v8 }
 0x66d   :  { %v1060_v20 = vpop.f32.mrb[10].mxu0 }
 0x66e   :  { %v3777_v21 = vpop.f32.mrb[11].mxu0  ;;  %v1142_v22 = vsel %vm302_vm3, %v1060_v20, -inf }
 0x66f   :  { %1143 = vmax.xlane.f32.xlu1 %v1142_v22 }
 0x680   :  { %1238 = vrot.lane.b32.xlu1 %v4236_v9, %s4134_s7 }
 0x6f7   :  { %v3772_v23 = vpop.f32.mrb[10].mxu1 }
 0x6f8   :  { %v983_v25 = vadd.f32 %v3772_v23, %v981_v24  ;;  %v971_v26 = vpop.f32.mrb[11].mxu1 }
 0x6f9   :  { %v982_v28 = vadd.f32 %v980_v27, %v971_v26  ;;  %v1737_v26 = vld [vmem:[#allocation8 + $0xc] sm:$0xf] }
 0x6fa   :  { %985 = vst.msk [vmem:[#allocation2 + $0x8] sm:$0xff] %vm65_vm0, %v983_v25 }
 0x6fb   :  { %984 = vst.msk [vmem:[#allocation2] sm:$0xff] %vm65_vm0, %v982_v28  ;;  %v1138_v29 = vpop.f32.mrb[12].mxu1 }
 0x6fc   :  { %v1144_v30 = vpop.xlane.xlu1 %1143  ;;  %v3782_v31 = vpop.f32.mrb[13].mxu1  ;;  %v1145_v32 = vsel %vm302_vm3, %v1138_v29, -inf }
 0x6fd   :  { %v1148_v33 = vsub.f32 %v1060_v20, %v1144_v30  ;;  %1146 = vmax.xlane.f32.xlu0 %v1145_v32 }
 0x6ff   :  { %v1150_v34 = vmul.f32 1.442695, %v1148_v33 }
 0x700   :  { %v1239_v35 = vpop.permute.xlu1 %1238 }
 0x701   :  { %3978 = vpow2.f32 %v1150_v34  ;;  %3789 = vmatpush3.msra.mxu1 %v1239_v35  ;;  %v1402_v5 = vld [vmem:[#allocation2 + $0x8] sm:$0xff] }
 0x702   :  { %3798 = vmatprep.subr.mxu1 %v4125_v8  ;;  %v1401_v11 = vld [vmem:[#allocation2] sm:$0xff] }
 0x70b   :  { %v3979_v36 = vpop.eup %3978 }
 0x70c   :  { %v1154_v37 = vsel %vm302_vm3, %v3979_v36, 0.0 }
 0x70d   :  { %1155 = vadd.xlane.f32.xlu1 %v1154_v37 }
 0x713   :  { %1162 = vrot.lane.b32.xlu0 %v4238_v10, %s4134_s7 }
 0x717   :  { %1409 = vrot.lane.b32.xlu0 %v4238_v10, %s4135_s8 }
 0x71e   :  { %1487 = vrot.lane.b32.xlu1 %v4236_v9, %s4135_s8 }
 0x722   :  { %1407 = vrot.lane.b32.xlu1 %v4238_v10, %s4136_s9 }
 0x78a   :  { %v1147_v38 = vpop.xlane.xlu0 %1146 }
 0x78b   :  { %v1149_v39 = vsub.f32 %v1138_v29, %v1147_v38 }
 0x78d   :  { %v1152_v40 = vmul.f32 1.442695, %v1149_v39 }
 0x78e   :  { %v1163_v41 = vpop.permute.xlu0 %1162 }
 0x78f   :  { %3980 = vpow2.f32 %v1152_v40  ;;  %3784 = vmatpush3.msra.mxu0 %v1163_v41 }
 0x790   :  { %3786 = vmatmul.mubr.msk.f32.vlgmr.msra.gmra.mrb[12].mxu0 %vm302_vm3, %v3979_v36  ;;  %3793 = vmatprep.subr.msk.mxu0 %vm484_vm4, %v1316_v48 }
 0x791   :  { %3794 = vmatpush3.msk.msra.mxu0 %vm484_vm4, %v1316_v48 }
 0x792   :  { %v1410_v43 = vpop.permute.xlu0 %1409  ;;  %3803 = vmatprep.subr.mxu0 %v4125_v8 }
 0x799   :  { %v3981_v42 = vpop.eup %3980 }
 0x79a   :  { %v1156_v44 = vpop.xlane.xlu1 %1155  ;;  %3791 = vmatmul.mubr.msk.f32.vlgmr.msra.gmra.mrb[14].mxu1 %vm302_vm3, %v3981_v42  ;;  %v1157_v45 = vsel %vm302_vm3, %v3981_v42, 0.0 }
 0x79b   :  { %3799 = vmatpush3.xpose.msk.msra.mxu1 %vm150_vm2, %v1410_v43  ;;  %1158 = vadd.xlane.f32.xlu0 %v1157_v45  ;;  %3982 = vrcp.f32 %v1156_v44 }
 0x79c   :  { %3800 = vmatprep.mubr.msk.f32.mxu1 %vm4126_vm1, %v4125_v8  ;;  %3808 = vmatprep.subr.mxu1 %v4125_v8 }
 0x79e   :  { %v1488_v46 = vpop.permute.xlu1 %1487 }
 0x7a2   :  { %v1408_v47 = vpop.permute.xlu1 %1407 }
 0x7a3   :  { %3801 = vmatmul.mubr.msk.f32.vlgmr.msra.gmra.mrb[16].mxu1 %vm150_vm2, %v1408_v47 }
 0x7a4   :  { %3810 = vmatprep.mubr.msk.f32.mxu1 %vm4126_vm1, %v4125_v8 }
 0x7a5   :  { %v3983_v50 = vpop.eup %3982 }
 0x7b1   :  { %1485 = vrot.lane.b32.xlu0 %v4236_v9, %s4136_s9 }
 0x828   :  { %v1159_v49 = vpop.xlane.xlu0 %1158 }
 0x829   :  { %3984 = vrcp.f32 %v1159_v49 }
 0x82c   :  { %v1486_v58 = vpop.permute.xlu0 %1485 }
 0x833   :  { %v3985_v54 = vpop.eup %3984 }
 0x863   :  { %v1234_v51 = vpop.f32.mrb[12].mxu0 }
 0x864   :  { %v1314_v52 = vmul.f32 %v3983_v50, %v1234_v51  ;;  %v3787_v53 = vpop.f32.mrb[13].mxu0 }
 0x866   :  { %3795 = vmatprep.mubr.msk.f32.mxu0 %vm150_vm2, %v1314_v52 }
 0x86d   :  { %v1310_v55 = vpop.f32.mrb[14].mxu1 }
 0x86e   :  { %v1315_v56 = vmul.f32 %v3985_v54, %v1310_v55  ;;  %v3792_v57 = vpop.f32.mrb[15].mxu1 }
 0x870   :  { %3796 = vmatmul.mubr.msk.f32.vlgmr.msra.gmra.mrb[14].mxu0 %vm150_vm2, %v1315_v56 }
 0x871   :  { %3804 = vmatpush3.xpose.msk.msra.mxu0 %vm150_vm2, %v1488_v46  ;;  %3805 = vmatprep.mubr.msk.f32.mxu0 %vm4126_vm1, %v4125_v8 }
 0x872   :  { %3813 = vmatprep.subr.mxu0 %v4125_v8 }
 0x874   :  { %3806 = vmatmul.mubr.msk.f32.vlgmr.msra.gmra.mrb[16].mxu0 %vm150_vm2, %v1486_v58 }
 0x875   :  { %3815 = vmatprep.mubr.msk.f32.mxu0 %vm4126_vm1, %v4125_v8 }
 0x876   :  { %v1481_v59 = vpop.f32.mrb[16].mxu1 }
 0x877   :  { %v3802_v60 = vpop.f32.mrb[17].mxu1  ;;  %v1563_v61 = vsel %vm302_vm3, %v1481_v59, -inf }
 0x878   :  { %1564 = vmax.xlane.f32.xlu1 %v1563_v61 }
 0x889   :  { %1659 = vrot.lane.b32.xlu1 %v4236_v9, %s4137_s10 }
 0x905   :  { %v1565_v62 = vpop.xlane.xlu1 %1564 }
 0x906   :  { %v1569_v63 = vsub.f32 %v1481_v59, %v1565_v62 }
 0x908   :  { %v1571_v0 = vmul.f32 1.442695, %v1569_v63 }
 0x909   :  { %v1660_v1 = vpop.permute.xlu1 %1659 }
 0x90a   :  { %3986 = vpow2.f32 %v1571_v0  ;;  %3814 = vmatpush3.msra.mxu0 %v1660_v1  ;;  %v2158_v1 = vld [vmem:[#allocation8 + $0x10] sm:$0xf] }
 0x90b   :  { %3823 = vmatprep.subr.mxu0 %v4125_v8 }
 0x914   :  { %v3987_v2 = vpop.eup %3986 }
 0x915   :  { %v1575_v3 = vsel %vm302_vm3, %v3987_v2, 0.0 }
 0x916   :  { %1576 = vadd.xlane.f32.xlu1 %v1575_v3 }
 0x927   :  { %1908 = vrot.lane.b32.xlu1 %v4236_v9, %s4138_s11 }
 0x92b   :  { %1828 = vrot.lane.b32.xlu1 %v4238_v10, %s4139_s12 }
 0x943   :  { %v3797_v4 = vpop.f32.mrb[14].mxu0 }
 0x944   :  { %v1404_v6 = vadd.f32 %v3797_v4, %v1402_v5  ;;  %v1392_v7 = vpop.f32.mrb[15].mxu0 }
 0x945   :  { %v1403_v12 = vadd.f32 %v1401_v11, %v1392_v7 }
 0x946   :  { %1406 = vst.msk [vmem:[#allocation2 + $0x8] sm:$0xff] %vm65_vm0, %v1404_v6 }
 0x947   :  { %1405 = vst.msk [vmem:[#allocation2] sm:$0xff] %vm65_vm0, %v1403_v12  ;;  %v1559_v13 = vpop.f32.mrb[16].mxu0 }
 0x948   :  { %v3807_v14 = vpop.f32.mrb[17].mxu0  ;;  %v1566_v15 = vsel %vm302_vm3, %v1559_v13, -inf }
 0x949   :  { %1567 = vmax.xlane.f32.xlu0 %v1566_v15 }
 0x94d   :  { %v1823_v47 = vld [vmem:[#allocation2 + $0x8] sm:$0xff] }
 0x94e   :  { %v1822_v50 = vld [vmem:[#allocation2] sm:$0xff] }
 0x95f   :  { %1583 = vrot.lane.b32.xlu0 %v4238_v10, %s4137_s10 }
 0x963   :  { %1830 = vrot.lane.b32.xlu0 %v4238_v10, %s4138_s11 }
 0x9a3   :  { %v1577_v20 = vpop.xlane.xlu1 %1576 }
 0x9a7   :  { %v1909_v21 = vpop.permute.xlu1 %1908 }
 0x9ab   :  { %v1829_v25 = vpop.permute.xlu1 %1828 }
 0x9d6   :  { %v1568_v16 = vpop.xlane.xlu0 %1567 }
 0x9d7   :  { %v1570_v17 = vsub.f32 %v1559_v13, %v1568_v16 }
 0x9d9   :  { %v1573_v18 = vmul.f32 1.442695, %v1570_v17 }
 0x9da   :  { %v1584_v19 = vpop.permute.xlu0 %1583 }
 0x9db   :  { %3988 = vpow2.f32 %v1573_v18  ;;  %3809 = vmatpush3.msra.mxu1 %v1584_v19 }
 0x9dc   :  { %3811 = vmatmul.mubr.msk.f32.vlgmr.msra.gmra.mrb[18].mxu1 %vm302_vm3, %v3987_v2  ;;  %3818 = vmatprep.subr.msk.mxu1 %vm484_vm4, %v1737_v26  ;;  %3990 = vrcp.f32 %v1577_v20 }
 0x9dd   :  { %3819 = vmatpush3.msk.msra.mxu1 %vm484_vm4, %v1737_v26 }
 0x9de   :  { %v1831_v23 = vpop.permute.xlu0 %1830  ;;  %3828 = vmatprep.subr.mxu1 %v4125_v8 }
 0x9e5   :  { %v3989_v22 = vpop.eup %3988 }
 0x9e6   :  { %3816 = vmatmul.mubr.msk.f32.vlgmr.msra.gmra.mrb[18].mxu0 %vm302_vm3, %v3989_v22  ;;  %v1578_v24 = vsel %vm302_vm3, %v3989_v22, 0.0  ;;  %v3991_v28 = vpop.eup %3990 }
 0x9e7   :  { %3824 = vmatpush3.xpose.msk.msra.mxu0 %vm150_vm2, %v1831_v23  ;;  %1579 = vadd.xlane.f32.xlu0 %v1578_v24 }
 0x9e8   :  { %3825 = vmatprep.mubr.msk.f32.mxu0 %vm4126_vm1, %v4125_v8  ;;  %3833 = vmatprep.subr.mxu0 %v4125_v8 }
 0x9ea   :  { %3826 = vmatmul.mubr.msk.f32.vlgmr.msra.gmra.mrb[20].mxu0 %vm150_vm2, %v1829_v25 }
 0x9eb   :  { %3835 = vmatprep.mubr.msk.f32.mxu0 %vm4126_vm1, %v4125_v8 }
 0x9fd   :  { %1906 = vrot.lane.b32.xlu0 %v4236_v9, %s4139_s12 }
 0xa74   :  { %v1580_v27 = vpop.xlane.xlu0 %1579 }
 0xa75   :  { %3992 = vrcp.f32 %v1580_v27 }
 0xa78   :  { %v1907_v39 = vpop.permute.xlu0 %1906 }
 0xa7f   :  { %v3993_v32 = vpop.eup %3992 }
 0xaaf   :  { %v1655_v29 = vpop.f32.mrb[18].mxu1 }
 0xab0   :  { %v1735_v30 = vmul.f32 %v3991_v28, %v1655_v29  ;;  %v3812_v31 = vpop.f32.mrb[19].mxu1 }
 0xab2   :  { %3820 = vmatprep.mubr.msk.f32.mxu1 %vm150_vm2, %v1735_v30 }
 0xab9   :  { %v1731_v33 = vpop.f32.mrb[18].mxu0 }
 0xaba   :  { %v1736_v34 = vmul.f32 %v3993_v32, %v1731_v33  ;;  %v3817_v35 = vpop.f32.mrb[19].mxu0 }
 0xabc   :  { %3821 = vmatmul.mubr.msk.f32.vlgmr.msra.gmra.mrb[20].mxu1 %vm150_vm2, %v1736_v34 }
 0xabd   :  { %3829 = vmatpush3.xpose.msk.msra.mxu1 %vm150_vm2, %v1909_v21  ;;  %v1902_v36 = vpop.f32.mrb[20].mxu0  ;;  %3830 = vmatprep.mubr.msk.f32.mxu1 %vm4126_vm1, %v4125_v8 }
 0xabe   :  { %v3827_v37 = vpop.f32.mrb[21].mxu0  ;;  %v1984_v38 = vsel %vm302_vm3, %v1902_v36, -inf  ;;  %3838 = vmatprep.subr.mxu1 %v4125_v8 }
 0xabf   :  { %1985 = vmax.xlane.f32.xlu1 %v1984_v38 }
 0xac0   :  { %3831 = vmatmul.mubr.msk.f32.vlgmr.msra.gmra.mrb[22].mxu1 %vm150_vm2, %v1907_v39 }
 0xac1   :  { %3840 = vmatprep.mubr.msk.f32.mxu1 %vm4126_vm1, %v4125_v8 }
 0xad0   :  { %2080 = vrot.lane.b32.xlu1 %v4236_v9, %s4140_s1 }
 0xb4c   :  { %v1986_v40 = vpop.xlane.xlu1 %1985 }
 0xb4d   :  { %v1990_v41 = vsub.f32 %v1902_v36, %v1986_v40 }
 0xb4f   :  { %v1992_v42 = vmul.f32 1.442695, %v1990_v41 }
 0xb50   :  { %v2081_v43 = vpop.permute.xlu1 %2080 }
 0xb51   :  { %3994 = vpow2.f32 %v1992_v42  ;;  %3839 = vmatpush3.msra.mxu1 %v2081_v43  ;;  %v2579_v43 = vld [vmem:[#allocation8 + $0x14] sm:$0xf] }
 0xb52   :  { %3848 = vmatprep.subr.mxu1 %v4125_v8 }
 0xb5b   :  { %v3995_v44 = vpop.eup %3994 }
 0xb5c   :  { %v1996_v45 = vsel %vm302_vm3, %v3995_v44, 0.0 }
 0xb5d   :  { %1997 = vadd.xlane.f32.xlu1 %v1996_v45 }
 0xb6e   :  { %2329 = vrot.lane.b32.xlu1 %v4236_v9, %s4141_s13 }
 0xb72   :  { %2249 = vrot.lane.b32.xlu1 %v4238_v10, %s4142_s14 }
 0xb8f   :  { %v3822_v46 = vpop.f32.mrb[20].mxu1 }
 0xb90   :  { %v1825_v48 = vadd.f32 %v3822_v46, %v1823_v47  ;;  %v1813_v49 = vpop.f32.mrb[21].mxu1 }
 0xb91   :  { %v1824_v51 = vadd.f32 %v1822_v50, %v1813_v49 }
 0xb92   :  { %1827 = vst.msk [vmem:[#allocation2 + $0x8] sm:$0xff] %vm65_vm0, %v1825_v48 }
 0xb93   :  { %1826 = vst.msk [vmem:[#allocation2] sm:$0xff] %vm65_vm0, %v1824_v51  ;;  %v1980_v52 = vpop.f32.mrb[22].mxu1 }
 0xb94   :  { %v3832_v53 = vpop.f32.mrb[23].mxu1  ;;  %v1987_v54 = vsel %vm302_vm3, %v1980_v52, -inf }
 0xb95   :  { %1988 = vmax.xlane.f32.xlu0 %v1987_v54 }
 0xb99   :  { %v2244_v25 = vld [vmem:[#allocation2 + $0x8] sm:$0xff] }
 0xb9a   :  { %v2243_v28 = vld [vmem:[#allocation2] sm:$0xff] }
 0xbab   :  { %2004 = vrot.lane.b32.xlu0 %v4238_v10, %s4140_s1 }
 0xbaf   :  { %2251 = vrot.lane.b32.xlu0 %v4238_v10, %s4141_s13 }
 0xbea   :  { %v1998_v59 = vpop.xlane.xlu1 %1997 }
 0xbee   :  { %v2330_v60 = vpop.permute.xlu1 %2329 }
 0xbf2   :  { %v2250_v0 = vpop.permute.xlu1 %2249 }
 0xc22   :  { %v1989_v55 = vpop.xlane.xlu0 %1988 }
 0xc23   :  { %v1991_v56 = vsub.f32 %v1980_v52, %v1989_v55 }
 0xc25   :  { %v1994_v57 = vmul.f32 1.442695, %v1991_v56 }
 0xc26   :  { %v2005_v58 = vpop.permute.xlu0 %2004 }
 0xc27   :  { %3996 = vpow2.f32 %v1994_v57  ;;  %3834 = vmatpush3.msra.mxu0 %v2005_v58 }
 0xc28   :  { %3836 = vmatmul.mubr.msk.f32.vlgmr.msra.gmra.mrb[22].mxu0 %vm302_vm3, %v3995_v44  ;;  %3843 = vmatprep.subr.msk.mxu0 %vm484_vm4, %v2158_v1  ;;  %3998 = vrcp.f32 %v1998_v59 }
 0xc29   :  { %3844 = vmatpush3.msk.msra.mxu0 %vm484_vm4, %v2158_v1 }
 0xc2a   :  { %v2252_v62 = vpop.permute.xlu0 %2251  ;;  %3853 = vmatprep.subr.mxu0 %v4125_v8 }
 0xc31   :  { %v3997_v61 = vpop.eup %3996 }
 0xc32   :  { %3841 = vmatmul.mubr.msk.f32.vlgmr.msra.gmra.mrb[24].mxu1 %vm302_vm3, %v3997_v61  ;;  %v1999_v63 = vsel %vm302_vm3, %v3997_v61, 0.0  ;;  %v3999_v3 = vpop.eup %3998 }
 0xc33   :  { %3849 = vmatpush3.xpose.msk.msra.mxu1 %vm150_vm2, %v2252_v62  ;;  %2000 = vadd.xlane.f32.xlu0 %v1999_v63 }
 0xc34   :  { %3850 = vmatprep.mubr.msk.f32.mxu1 %vm4126_vm1, %v4125_v8  ;;  %3858 = vmatprep.subr.mxu1 %v4125_v8 }
 0xc36   :  { %3851 = vmatmul.mubr.msk.f32.vlgmr.msra.gmra.mrb[26].mxu1 %vm150_vm2, %v2250_v0 }
 0xc37   :  { %3860 = vmatprep.mubr.msk.f32.mxu1 %vm4126_vm1, %v4125_v8 }
 0xc49   :  { %2327 = vrot.lane.b32.xlu0 %v4236_v9, %s4142_s14 }
 0xcc0   :  { %v2001_v2 = vpop.xlane.xlu0 %2000 }
 0xcc1   :  { %4000 = vrcp.f32 %v2001_v2 }
 0xcc4   :  { %v2328_v17 = vpop.permute.xlu0 %2327 }
 0xccb   :  { %v4001_v7 = vpop.eup %4000 }
 0xcfb   :  { %v2076_v4 = vpop.f32.mrb[22].mxu0 }
 0xcfc   :  { %v2156_v5 = vmul.f32 %v3999_v3, %v2076_v4  ;;  %v3837_v6 = vpop.f32.mrb[23].mxu0 }
 0xcfe   :  { %3845 = vmatprep.mubr.msk.f32.mxu0 %vm150_vm2, %v2156_v5 }
 0xd05   :  { %v2152_v11 = vpop.f32.mrb[24].mxu1 }
 0xd06   :  { %v2157_v12 = vmul.f32 %v4001_v7, %v2152_v11  ;;  %v3842_v13 = vpop.f32.mrb[25].mxu1 }
 0xd08   :  { %3846 = vmatmul.mubr.msk.f32.vlgmr.msra.gmra.mrb[24].mxu0 %vm150_vm2, %v2157_v12 }
 0xd09   :  { %3854 = vmatpush3.xpose.msk.msra.mxu0 %vm150_vm2, %v2330_v60  ;;  %v2323_v14 = vpop.f32.mrb[26].mxu1  ;;  %3855 = vmatprep.mubr.msk.f32.mxu0 %vm4126_vm1, %v4125_v8 }
 0xd0a   :  { %v3852_v15 = vpop.f32.mrb[27].mxu1  ;;  %v2405_v16 = vsel %vm302_vm3, %v2323_v14, -inf  ;;  %3863 = vmatprep.subr.mxu0 %v4125_v8 }
 0xd0b   :  { %2406 = vmax.xlane.f32.xlu1 %v2405_v16 }
 0xd0c   :  { %3856 = vmatmul.mubr.msk.f32.vlgmr.msra.gmra.mrb[26].mxu0 %vm150_vm2, %v2328_v17 }
 0xd0d   :  { %3865 = vmatprep.mubr.msk.f32.mxu0 %vm4126_vm1, %v4125_v8 }
 0xd1c   :  { %2501 = vrot.lane.b32.xlu1 %v4236_v9, %s4143_s15 }
 0xd98   :  { %v2407_v18 = vpop.xlane.xlu1 %2406 }
 0xd99   :  { %v2411_v19 = vsub.f32 %v2323_v14, %v2407_v18 }
 0xd9b   :  { %v2413_v20 = vmul.f32 1.442695, %v2411_v19 }
 0xd9c   :  { %v2502_v21 = vpop.permute.xlu1 %2501 }
 0xd9d   :  { %4002 = vpow2.f32 %v2413_v20  ;;  %3864 = vmatpush3.msra.mxu0 %v2502_v21  ;;  %v3000_v21 = vld [vmem:[#allocation8 + $0x18] sm:$0xf] }
 0xd9e   :  { %3873 = vmatprep.subr.mxu0 %v4125_v8 }
 0xda7   :  { %v4003_v22 = vpop.eup %4002 }
 0xda8   :  { %v2417_v23 = vsel %vm302_vm3, %v4003_v22, 0.0 }
 0xda9   :  { %2418 = vadd.xlane.f32.xlu1 %v2417_v23 }
 0xdba   :  { %2750 = vrot.lane.b32.xlu1 %v4236_v9, %s4144_s16 }
 0xdbe   :  { %2670 = vrot.lane.b32.xlu1 %v4238_v10, %s4145_s17 }
 0xddb   :  { %v3847_v24 = vpop.f32.mrb[24].mxu0 }
 0xddc   :  { %v2246_v26 = vadd.f32 %v3847_v24, %v2244_v25  ;;  %v2234_v27 = vpop.f32.mrb[25].mxu0 }
 0xddd   :  { %v2245_v29 = vadd.f32 %v2243_v28, %v2234_v27 }
 0xdde   :  { %2248 = vst.msk [vmem:[#allocation2 + $0x8] sm:$0xff] %vm65_vm0, %v2246_v26 }
 0xddf   :  { %2247 = vst.msk [vmem:[#allocation2] sm:$0xff] %vm65_vm0, %v2245_v29  ;;  %v2401_v30 = vpop.f32.mrb[26].mxu0 }
 0xde0   :  { %v3857_v31 = vpop.f32.mrb[27].mxu0  ;;  %v2408_v32 = vsel %vm302_vm3, %v2401_v30, -inf }
 0xde1   :  { %2409 = vmax.xlane.f32.xlu0 %v2408_v32 }
 0xde5   :  { %v2665_v0 = vld [vmem:[#allocation2 + $0x8] sm:$0xff] }
 0xde6   :  { %v2664_v3 = vld [vmem:[#allocation2] sm:$0xff] }
 0xdf7   :  { %2425 = vrot.lane.b32.xlu0 %v4238_v10, %s4143_s15 }
 0xdfb   :  { %2672 = vrot.lane.b32.xlu0 %v4238_v10, %s4144_s16 }
 0xe36   :  { %v2419_v37 = vpop.xlane.xlu1 %2418 }
 0xe3a   :  { %v2751_v38 = vpop.permute.xlu1 %2750 }
 0xe3e   :  { %v2671_v42 = vpop.permute.xlu1 %2670 }
 0xe6e   :  { %v2410_v33 = vpop.xlane.xlu0 %2409 }
 0xe6f   :  { %v2412_v34 = vsub.f32 %v2401_v30, %v2410_v33 }
 0xe71   :  { %v2415_v35 = vmul.f32 1.442695, %v2412_v34 }
 0xe72   :  { %v2426_v36 = vpop.permute.xlu0 %2425 }
 0xe73   :  { %4004 = vpow2.f32 %v2415_v35  ;;  %3859 = vmatpush3.msra.mxu1 %v2426_v36 }
 0xe74   :  { %3861 = vmatmul.mubr.msk.f32.vlgmr.msra.gmra.mrb[28].mxu1 %vm302_vm3, %v4003_v22  ;;  %3868 = vmatprep.subr.msk.mxu1 %vm484_vm4, %v2579_v43  ;;  %4006 = vrcp.f32 %v2419_v37 }
 0xe75   :  { %3869 = vmatpush3.msk.msra.mxu1 %vm484_vm4, %v2579_v43 }
 0xe76   :  { %v2673_v40 = vpop.permute.xlu0 %2672  ;;  %3878 = vmatprep.subr.mxu1 %v4125_v8 }
 0xe7d   :  { %v4005_v39 = vpop.eup %4004 }
 0xe7e   :  { %3866 = vmatmul.mubr.msk.f32.vlgmr.msra.gmra.mrb[28].mxu0 %vm302_vm3, %v4005_v39  ;;  %v2420_v41 = vsel %vm302_vm3, %v4005_v39, 0.0  ;;  %v4007_v45 = vpop.eup %4006 }
 0xe7f   :  { %3874 = vmatpush3.xpose.msk.msra.mxu0 %vm150_vm2, %v2673_v40  ;;  %2421 = vadd.xlane.f32.xlu0 %v2420_v41 }
 0xe80   :  { %3875 = vmatprep.mubr.msk.f32.mxu0 %vm4126_vm1, %v4125_v8  ;;  %3883 = vmatprep.subr.mxu0 %v4125_v8 }
 0xe82   :  { %3876 = vmatmul.mubr.msk.f32.vlgmr.msra.gmra.mrb[30].mxu0 %vm150_vm2, %v2671_v42 }
 0xe83   :  { %3885 = vmatprep.mubr.msk.f32.mxu0 %vm4126_vm1, %v4125_v8 }
 0xe95   :  { %2748 = vrot.lane.b32.xlu0 %v4236_v9, %s4145_s17 }
 0xf0c   :  { %v2422_v44 = vpop.xlane.xlu0 %2421 }
 0xf0d   :  { %4008 = vrcp.f32 %v2422_v44 }
 0xf10   :  { %v2749_v56 = vpop.permute.xlu0 %2748 }
 0xf17   :  { %v4009_v49 = vpop.eup %4008 }
 0xf47   :  { %v2497_v46 = vpop.f32.mrb[28].mxu1 }
 0xf48   :  { %v2577_v47 = vmul.f32 %v4007_v45, %v2497_v46  ;;  %v3862_v48 = vpop.f32.mrb[29].mxu1 }
 0xf4a   :  { %3870 = vmatprep.mubr.msk.f32.mxu1 %vm150_vm2, %v2577_v47 }
 0xf51   :  { %v2573_v50 = vpop.f32.mrb[28].mxu0 }
 0xf52   :  { %v2578_v51 = vmul.f32 %v4009_v49, %v2573_v50  ;;  %v3867_v52 = vpop.f32.mrb[29].mxu0 }
 0xf54   :  { %3871 = vmatmul.mubr.msk.f32.vlgmr.msra.gmra.mrb[30].mxu1 %vm150_vm2, %v2578_v51 }
 0xf55   :  { %3879 = vmatpush3.xpose.msk.msra.mxu1 %vm150_vm2, %v2751_v38  ;;  %v2744_v53 = vpop.f32.mrb[30].mxu0  ;;  %3880 = vmatprep.mubr.msk.f32.mxu1 %vm4126_vm1, %v4125_v8 }
 0xf56   :  { %v3877_v54 = vpop.f32.mrb[31].mxu0  ;;  %v2826_v55 = vsel %vm302_vm3, %v2744_v53, -inf  ;;  %3888 = vmatprep.subr.mxu1 %v4125_v8 }
 0xf57   :  { %2827 = vmax.xlane.f32.xlu1 %v2826_v55  ;;  %v3421_v54 = vld [vmem:[#allocation8 + $0x1c] sm:$0xf] }
 0xf58   :  { %3881 = vmatmul.mubr.msk.f32.vlgmr.msra.gmra.mrb[32].mxu1 %vm150_vm2, %v2749_v56 }
 0xf59   :  { %3890 = vmatprep.mubr.msk.f32.mxu1 %vm4126_vm1, %v4125_v8 }
 0xf68   :  { %2922 = vrot.lane.b32.xlu1 %v4236_v9, %s4146_s19 }
 0xfe4   :  { %v2828_v57 = vpop.xlane.xlu1 %2827 }
 0xfe5   :  { %v2832_v58 = vsub.f32 %v2744_v53, %v2828_v57 }
 0xfe7   :  { %v2834_v59 = vmul.f32 1.442695, %v2832_v58 }
 0xfe8   :  { %v2923_v60 = vpop.permute.xlu1 %2922 }
 0xfe9   :  { %4010 = vpow2.f32 %v2834_v59  ;;  %3889 = vmatpush3.msra.mxu1 %v2923_v60 }
 0xfea   :  { %3898 = vmatprep.subr.mxu1 %v4125_v8 }
 0xff3   :  { %v4011_v61 = vpop.eup %4010 }
 0xff4   :  { %v2838_v62 = vsel %vm302_vm3, %v4011_v61, 0.0 }
 0xff5   :  { %2839 = vadd.xlane.f32.xlu1 %v2838_v62 }
0x1006   :  { %3171 = vrot.lane.b32.xlu1 %v4236_v9, %s4147_s20 }
0x100a   :  { %3091 = vrot.lane.b32.xlu1 %v4238_v10, %s4148_s21 }
0x1027   :  { %v3872_v63 = vpop.f32.mrb[30].mxu1 }
0x1028   :  { %v2667_v1 = vadd.f32 %v3872_v63, %v2665_v0  ;;  %v2655_v2 = vpop.f32.mrb[31].mxu1 }
0x1029   :  { %v2666_v4 = vadd.f32 %v2664_v3, %v2655_v2 }
0x102a   :  { %2669 = vst.msk [vmem:[#allocation2 + $0x8] sm:$0xff] %vm65_vm0, %v2667_v1 }
0x102b   :  { %2668 = vst.msk [vmem:[#allocation2] sm:$0xff] %vm65_vm0, %v2666_v4  ;;  %v2822_v5 = vpop.f32.mrb[32].mxu1 }
0x102c   :  { %v3882_v6 = vpop.f32.mrb[33].mxu1  ;;  %v2829_v7 = vsel %vm302_vm3, %v2822_v5, -inf }
0x102d   :  { %2830 = vmax.xlane.f32.xlu0 %v2829_v7  ;;  %v3617_v6 = vld [vmem:[%s4539_s3] ss:$0 sm:$0xff] }
0x1031   :  { %v3086_v42 = vld [vmem:[#allocation2 + $0x8] sm:$0xff] }
0x1032   :  { %v3085_v45 = vld [vmem:[#allocation2] sm:$0xff] }
0x1043   :  { %2846 = vrot.lane.b32.xlu0 %v4238_v10, %s4146_s19 }
0x1047   :  { %3093 = vrot.lane.b32.xlu0 %v4238_v10, %s4147_s20 }
0x1082   :  { %v2840_v15 = vpop.xlane.xlu1 %2839 }
0x1086   :  { %v3172_v16 = vpop.permute.xlu1 %3171 }
0x108a   :  { %v3092_v20 = vpop.permute.xlu1 %3091 }
0x10ba   :  { %v2831_v11 = vpop.xlane.xlu0 %2830 }
0x10bb   :  { %v2833_v12 = vsub.f32 %v2822_v5, %v2831_v11 }
0x10bd   :  { %v2836_v13 = vmul.f32 1.442695, %v2833_v12 }
0x10be   :  { %v2847_v14 = vpop.permute.xlu0 %2846 }
0x10bf   :  { %4012 = vpow2.f32 %v2836_v13  ;;  %3884 = vmatpush3.msra.mxu0 %v2847_v14 }
0x10c0   :  { %3886 = vmatmul.mubr.msk.f32.vlgmr.msra.gmra.mrb[32].mxu0 %vm302_vm3, %v4011_v61  ;;  %3893 = vmatprep.subr.msk.mxu0 %vm484_vm4, %v3000_v21  ;;  %4014 = vrcp.f32 %v2840_v15 }
0x10c1   :  { %3894 = vmatpush3.msk.msra.mxu0 %vm484_vm4, %v3000_v21 }
0x10c2   :  { %v3094_v18 = vpop.permute.xlu0 %3093  ;;  %3903 = vmatprep.subr.mxu0 %v4125_v8 }
0x10c9   :  { %v4013_v17 = vpop.eup %4012 }
0x10ca   :  { %3891 = vmatmul.mubr.msk.f32.vlgmr.msra.gmra.mrb[34].mxu1 %vm302_vm3, %v4013_v17  ;;  %v2841_v19 = vsel %vm302_vm3, %v4013_v17, 0.0  ;;  %v4015_v23 = vpop.eup %4014 }
0x10cb   :  { %3899 = vmatpush3.xpose.msk.msra.mxu1 %vm150_vm2, %v3094_v18  ;;  %2842 = vadd.xlane.f32.xlu0 %v2841_v19 }
0x10cc   :  { %3900 = vmatprep.mubr.msk.f32.mxu1 %vm4126_vm1, %v4125_v8  ;;  %3908 = vmatprep.subr.mxu1 %v4125_v8 }
0x10ce   :  { %3901 = vmatmul.mubr.msk.f32.vlgmr.msra.gmra.mrb[36].mxu1 %vm150_vm2, %v3092_v20 }
0x10cf   :  { %3910 = vmatprep.mubr.msk.f32.mxu1 %vm4126_vm1, %v4125_v8 }
0x10e1   :  { %3169 = vrot.lane.b32.xlu0 %v4236_v9, %s4148_s21 }
0x1158   :  { %v2843_v22 = vpop.xlane.xlu0 %2842 }
0x1159   :  { %4016 = vrcp.f32 %v2843_v22 }
0x115c   :  { %v3170_v34 = vpop.permute.xlu0 %3169 }
0x1163   :  { %v4017_v27 = vpop.eup %4016 }
0x1193   :  { %v2918_v24 = vpop.f32.mrb[32].mxu0 }
0x1194   :  { %v2998_v25 = vmul.f32 %v4015_v23, %v2918_v24  ;;  %v3887_v26 = vpop.f32.mrb[33].mxu0 }
0x1196   :  { %3895 = vmatprep.mubr.msk.f32.mxu0 %vm150_vm2, %v2998_v25 }
0x119d   :  { %v2994_v28 = vpop.f32.mrb[34].mxu1 }
0x119e   :  { %v2999_v29 = vmul.f32 %v4017_v27, %v2994_v28  ;;  %v3892_v30 = vpop.f32.mrb[35].mxu1 }
0x11a0   :  { %3896 = vmatmul.mubr.msk.f32.vlgmr.msra.gmra.mrb[34].mxu0 %vm150_vm2, %v2999_v29 }
0x11a1   :  { %3904 = vmatpush3.xpose.msk.msra.mxu0 %vm150_vm2, %v3172_v16  ;;  %v3165_v31 = vpop.f32.mrb[36].mxu1  ;;  %3905 = vmatprep.mubr.msk.f32.mxu0 %vm4126_vm1, %v4125_v8 }
0x11a2   :  { %v3902_v32 = vpop.f32.mrb[37].mxu1  ;;  %v3247_v33 = vsel %vm302_vm3, %v3165_v31, -inf  ;;  %3913 = vmatprep.subr.mxu0 %v4125_v8 }
0x11a3   :  { %3248 = vmax.xlane.f32.xlu1 %v3247_v33 }
0x11a4   :  { %3906 = vmatmul.mubr.msk.f32.vlgmr.msra.gmra.mrb[36].mxu0 %vm150_vm2, %v3170_v34 }
0x11a5   :  { %3915 = vmatprep.mubr.msk.f32.mxu0 %vm4126_vm1, %v4125_v8 }
0x11b4   :  { %3343 = vrot.lane.b32.xlu1 %v4236_v9, %s4149_s22 }
0x1230   :  { %v3249_v35 = vpop.xlane.xlu1 %3248 }
0x1231   :  { %v3253_v36 = vsub.f32 %v3165_v31, %v3249_v35 }
0x1233   :  { %v3255_v37 = vmul.f32 1.442695, %v3253_v36 }
0x1234   :  { %v3344_v38 = vpop.permute.xlu1 %3343 }
0x1235   :  { %4018 = vpow2.f32 %v3255_v37  ;;  %3914 = vmatpush3.msra.mxu0 %v3344_v38 }
0x123f   :  { %v4019_v39 = vpop.eup %4018 }
0x1240   :  { %v3259_v40 = vsel %vm302_vm3, %v4019_v39, 0.0 }
0x1241   :  { %3260 = vadd.xlane.f32.xlu1 %v3259_v40 }
0x1273   :  { %v3897_v41 = vpop.f32.mrb[34].mxu0 }
0x1274   :  { %v3088_v43 = vadd.f32 %v3897_v41, %v3086_v42  ;;  %v3076_v44 = vpop.f32.mrb[35].mxu0 }
0x1275   :  { %v3087_v46 = vadd.f32 %v3085_v45, %v3076_v44 }
0x1276   :  { %3090 = vst.msk [vmem:[#allocation2 + $0x8] sm:$0xff] %vm65_vm0, %v3088_v43 }
0x1277   :  { %3089 = vst.msk [vmem:[#allocation2] sm:$0xff] %vm65_vm0, %v3087_v46  ;;  %v3243_v8 = vpop.f32.mrb[36].mxu0 }
0x1278   :  { %v3907_v9 = vpop.f32.mrb[37].mxu0  ;;  %v3250_v47 = vsel %vm302_vm3, %v3243_v8, -inf }
0x1279   :  { %3251 = vmax.xlane.f32.xlu0 %v3250_v47 }
0x127d   :  { %v3507_v1 = vld [vmem:[#allocation2 + $0x8] sm:$0xff] }
0x127e   :  { %v3506_v4 = vld [vmem:[#allocation2] sm:$0xff] }
0x128f   :  { %3267 = vrot.lane.b32.xlu0 %v4238_v10, %s4149_s22 }
0x12ce   :  { %v3261_v10 = vpop.xlane.xlu1 %3260 }
0x1306   :  { %v3252_v48 = vpop.xlane.xlu0 %3251 }
0x1307   :  { %v3254_v49 = vsub.f32 %v3243_v8, %v3252_v48 }
0x1309   :  { %v3257_v50 = vmul.f32 1.442695, %v3254_v49 }
0x130a   :  { %v3268_v51 = vpop.permute.xlu0 %3267 }
0x130b   :  { %4020 = vpow2.f32 %v3257_v50  ;;  %3909 = vmatpush3.msra.mxu1 %v3268_v51 }
0x130c   :  { %3911 = vmatmul.mubr.msk.f32.vlgmr.msra.gmra.mrb[38].mxu1 %vm302_vm3, %v4019_v39  ;;  %3918 = vmatprep.subr.msk.mxu1 %vm484_vm4, %v3421_v54  ;;  %4022 = vrcp.f32 %v3261_v10 }
0x130d   :  { %3919 = vmatpush3.msk.msra.mxu1 %vm484_vm4, %v3421_v54 }
0x1315   :  { %v4021_v52 = vpop.eup %4020 }
0x1316   :  { %3916 = vmatmul.mubr.msk.f32.vlgmr.msra.gmra.mrb[38].mxu0 %vm302_vm3, %v4021_v52  ;;  %v3262_v53 = vsel %vm302_vm3, %v4021_v52, 0.0  ;;  %v4023_v56 = vpop.eup %4022 }
0x1317   :  { %3263 = vadd.xlane.f32.xlu0 %v3262_v53 }
0x13a4   :  { %v3264_v55 = vpop.xlane.xlu0 %3263 }
0x13a5   :  { %4024 = vrcp.f32 %v3264_v55 }
0x13af   :  { %v4025_v60 = vpop.eup %4024 }
0x13df   :  { %v3339_v57 = vpop.f32.mrb[38].mxu1 }
0x13e0   :  { %v3419_v58 = vmul.f32 %v4023_v56, %v3339_v57  ;;  %v3912_v59 = vpop.f32.mrb[39].mxu1 }
0x13e2   :  { %3920 = vmatprep.mubr.msk.f32.mxu1 %vm150_vm2, %v3419_v58 }
0x13e9   :  { %v3415_v61 = vpop.f32.mrb[38].mxu0 }
0x13ea   :  { %v3420_v62 = vmul.f32 %v4025_v60, %v3415_v61  ;;  %v3917_v63 = vpop.f32.mrb[39].mxu0 }
0x13ec   :  { %3921 = vmatmul.mubr.msk.f32.vlgmr.msra.gmra.mrb[40].mxu1 %vm150_vm2, %v3420_v62 }
0x14bf   :  { %v3922_v0 = vpop.f32.mrb[40].mxu1 }
0x14c0   :  { %v3509_v2 = vadd.f32 %v3922_v0, %v3507_v1  ;;  %v3497_v3 = vpop.f32.mrb[41].mxu1 }
0x14c1   :  { %v3508_v5 = vadd.f32 %v3506_v4, %v3497_v3 }
0x14c2   :  { %3511 = vst.msk [vmem:[#allocation2 + $0x8] sm:$0xff] %vm65_vm0, %v3509_v2 }
0x14c3   :  { %3510 = vst.msk [vmem:[#allocation2] sm:$0xff] %vm65_vm0, %v3508_v5 }
0x14c9   :  { %v3513_v7 = vld [vmem:[#allocation2 + $0x8] sm:$0xff] }
0x14ca   :  { %v3512_v11 = vld [vmem:[#allocation2] sm:$0xff]  ;;  %v3522_v12 = vadd.f32 %v3617_v6, %v3513_v7 }
0x14cb   :  { %v3521_v13 = vadd.f32 %v3617_v6, %v3512_v11 }
0x14cc   :  { %3524 = vst.msk [vmem:[#allocation9 + $0x8] sm:$0xff] %vm65_vm0, %v3522_v12 }
0x14cd   :  { %3523 = vst.msk [vmem:[#allocation9] sm:$0xff] %vm65_vm0, %v3521_v13 }
0x14ce   :  { %4103 = shalt.err (!%p4100_p0)
}
0x14cf   :  { %s4104_s26 = scalar_lea.hbm %s4540_s4, 256 }
0x14d0   :  { %p4105_p1 = scmp.ne.s32.totalorder %s4540_s4, %s4104_s26  ;;  %p4108_p2 = scmp.lt.u32.totalorder %s4104_s26, %s4540_s4 }
0x14d2   :  { %p4110_p3 = pnand %p4108_p2, %p4105_p1 }
0x14d4   :  { %4113 = shalt.err (!%p4110_p3)
}
0x14d5   :  { %3536 = dma.vmem_to_hbm [thread:$0]  %s3531_s18, 256, %s4540_s4, [#allocation5], %s4122_s27, %s4122_s27, %s4123_s28  }
0x14d6   :  { %4118 = dma.done.wait [#allocation5], 256  }
0x14d7   :  { %4119 = vsyncadd [#allocation5], 4294967040 }
0x14d8   :  { %3540 = vsyncpa [#allocation4], 1 }
0x14d9   :  { %3541 = vsyncpa [#allocation7], 1 }
0x14da   :  { %3542 = vsyncpa [#allocation5], 1 }

</bundles_post_ra>
